<compile_context>
chip_gen: v7x
topology: tpu7x:2x2x1
jax: 0.10.0
libtpu: 0.0.40
codegen_flags: <defaults>
</compile_context>

<pallas_src>
import math
import functools

import jax
import jax.numpy as jnp
from jax import lax
from jax.experimental import pallas as pl
from jax.experimental.pallas import tpu as pltpu


def _round_up(x, m):
    return (x + m - 1) // m * m


def _zero_map(ndim):
    return lambda i, _n=ndim: (0,) * _n


def _full_spec(shape):
    return pl.BlockSpec(shape, _zero_map(len(shape)))


# ------------------------------ fused kernel --------------------------------


def fused_transformer_kernel(T, num_layers,
                             x_ref,
                             wq_ref, bq_ref, wk_ref, bk_ref, wv_ref, bv_ref,
                             w0_ref, b0_ref, w1_ref, b1_ref, w2_ref, b2_ref,
                             cw_ref, cb_ref,
                             logits_ref, attn_ref):
    Tp = x_ref.shape[0]
    NEG = jnp.float32(-1e30)

    # Validity masks for the padded sequence positions (static T).
    row_valid = lax.broadcasted_iota(jnp.int32, (Tp, Tp), 0) < T   # query axis
    col_valid = lax.broadcasted_iota(jnp.int32, (Tp, Tp), 1) < T   # key axis

    x = x_ref[...]                                                 # (Tp, DM) f32

    for l in range(num_layers):                                    # unrolled
        xb = x.astype(jnp.bfloat16)
        q = jnp.dot(xb, wq_ref[l], preferred_element_type=jnp.float32) + bq_ref[l]
        k = jnp.dot(xb, wk_ref[l], preferred_element_type=jnp.float32) + bk_ref[l]
        v = jnp.dot(xb, wv_ref[l], preferred_element_type=jnp.float32) + bv_ref[l]

        # scores[i, j] = q_i . k_j  (1/sqrt(d_model) already folded into wq/bq).
        # dot_general contracting dim 1 of both operands -> no explicit k.T.
        scores = lax.dot_general(
            q.astype(jnp.bfloat16), k.astype(jnp.bfloat16),
            dimension_numbers=(((1,), (1,)), ((), ())),
            preferred_element_type=jnp.float32)

        # Padded query rows must not contribute to the axis-0 softmax sums.
        scores = jnp.where(row_valid, scores, NEG)

        # torch.nn.Softmax(0): normalize along dim 0 — columns sum to 1.
        m = jnp.max(scores, axis=0, keepdims=True)
        e = jnp.exp(scores - m)
        attn = e / jnp.sum(e, axis=0, keepdims=True)
        # Zero padded key columns so padded V rows (== bias) cannot leak into ctx.
        attn = jnp.where(col_valid, attn, 0.0)
        attn_ref[l] = attn

        ctx = jnp.dot(attn.astype(jnp.bfloat16), v.astype(jnp.bfloat16),
                      preferred_element_type=jnp.float32)          # (Tp, DI)
        sa = jnp.dot(ctx.astype(jnp.bfloat16), w0_ref[l],
                     preferred_element_type=jnp.float32) + b0_ref[l]
        res = sa + x

        h = jnp.dot(res.astype(jnp.bfloat16), w1_ref[l],
                    preferred_element_type=jnp.float32) + b1_ref[l]
        h = jnp.maximum(h, 0.0)
        ff = jnp.dot(h.astype(jnp.bfloat16), w2_ref[l],
                     preferred_element_type=jnp.float32) + b2_ref[l]
        x = ff + res

    # Final classifier (lane-dense padded output, sliced outside the kernel).
    logits_ref[...] = (jnp.dot(x.astype(jnp.bfloat16), cw_ref[...],
                               preferred_element_type=jnp.float32) + cb_ref[...])


# ----------------------------- param handling -------------------------------


def _linear_params(key, in_f, out_f):
    # Matches nn.Linear default init (uniform(-1/sqrt(in), 1/sqrt(in))),
    # deterministic via JAX PRNG. Weight stored as (in_f, out_f).
    k_w, k_b = jax.random.split(key)
    bound = 1.0 / math.sqrt(in_f)
    w = jax.random.uniform(k_w, (in_f, out_f), jnp.float32, -bound, bound)
    b = jax.random.uniform(k_b, (1, out_f), jnp.float32, -bound, bound)
    return w, b


def init_params(key, vocab_size=27, d_model=90, d_internal=75,
                num_classes=3, num_layers=2, num_positions=20):
    keys = jax.random.split(key, 4 + num_layers)
    params = {
        "word_embedding": jax.random.normal(keys[0], (vocab_size, d_model),
                                            jnp.float32),
        "positional_embedding": jax.random.normal(keys[1], (num_positions, d_model),
                                                  jnp.float32),
    }
    layers = []
    for li in range(num_layers):
        lk = jax.random.split(keys[2 + li], 6)
        wq, bq = _linear_params(lk[0], d_model, d_internal)
        wk, bk = _linear_params(lk[1], d_model, d_internal)
        wv, bv = _linear_params(lk[2], d_model, d_internal)
        w0, b0 = _linear_params(lk[3], d_internal, d_model)
        w1, b1 = _linear_params(lk[4], d_model, d_model * 2)
        w2, b2 = _linear_params(lk[5], d_model * 2, d_model)
        layers.append((wq, bq, wk, bk, wv, bv, w0, b0, w1, b1, w2, b2))
    params["layers"] = layers
    cw, cb = _linear_params(keys[2 + num_layers], d_model, num_classes)
    params["classifier_w"] = cw
    params["classifier_b"] = cb
    return params


def prepare_params(params, T):
    """One-time host-side transform for the fused kernel:
    fold the attention scale into W_Q/b_Q, pad feature dims to 128-lane
    multiples, stack per-layer weights with a leading layer dim, cast matmul
    weights to bf16 (biases stay f32)."""
    word_emb = params["word_embedding"]
    d_model = word_emb.shape[1]
    layers = params["layers"]
    num_layers = len(layers)
    d_internal = layers[0][0].shape[1]
    d_ff = layers[0][8].shape[1]
    num_classes = params["classifier_w"].shape[1]

    DM = _round_up(d_model, 128)
    DI = _round_up(d_internal, 128)
    DF = _round_up(d_ff, 128)
    NC = _round_up(num_classes, 128)
    Tp = _round_up(max(T, 8), 32)

    scale = 1.0 / math.sqrt(d_model)   # uses the *original* d_model

    def pad_w(w, r, c):
        return jnp.pad(w, ((0, r - w.shape[0]), (0, c - w.shape[1]))).astype(jnp.bfloat16)

    def pad_b(b, c):
        b = jnp.asarray(b).reshape(1, -1)
        return jnp.pad(b, ((0, 0), (0, c - b.shape[1]))).astype(jnp.float32)

    stk = lambda xs: jnp.stack(xs, axis=0)

    kp = {
        "word_embedding": word_emb,
        "positional_embedding": params["positional_embedding"],
        "wq": stk([pad_w(l[0] * scale, DM, DI) for l in layers]),
        "bq": stk([pad_b(l[1] * scale, DI) for l in layers]),
        "wk": stk([pad_w(l[2], DM, DI) for l in layers]),
        "bk": stk([pad_b(l[3], DI) for l in layers]),
        "wv": stk([pad_w(l[4], DM, DI) for l in layers]),
        "bv": stk([pad_b(l[5], DI) for l in layers]),
        "w0": stk([pad_w(l[6], DI, DM) for l in layers]),
        "b0": stk([pad_b(l[7], DM) for l in layers]),
        "w1": stk([pad_w(l[8], DM, DF) for l in layers]),
        "b1": stk([pad_b(l[9], DF) for l in layers]),
        "w2": stk([pad_w(l[10], DF, DM) for l in layers]),
        "b2": stk([pad_b(l[11], DM) for l in layers]),
        "cw": pad_w(params["classifier_w"], DM, NC),
        "cb": pad_b(params["classifier_b"], NC),
    }
    cfg = dict(T=T, Tp=Tp, d_model=d_model, DM=DM, DI=DI, DF=DF, NC=NC,
               num_classes=num_classes, num_layers=num_layers)
    return kp, cfg


# ------------------------------- forward ------------------------------------


_WEIGHT_ORDER = ("wq", "bq", "wk", "bk", "wv", "bv",
                 "w0", "b0", "w1", "b1", "w2", "b2", "cw", "cb")


def make_forward(cfg):
    T, Tp = cfg["T"], cfg["Tp"]
    DM, NC = cfg["DM"], cfg["NC"]
    L = cfg["num_layers"]
    d_model = cfg["d_model"]
    num_classes = cfg["num_classes"]

    kernel = functools.partial(fused_transformer_kernel, T, L)

    @jax.jit
    def forward(indices, kp):
        # Embedding lookup + positional add (plain-JAX glue), then pad to the
        # lane/sublane-aligned kernel shape (Tp, DM).
        # TODO(synk): could be fused into the kernel via scalar-prefetch + row
        # gather; kept outside since it is a single tiny gather.
        x = jnp.take(kp["word_embedding"], indices, axis=0) + kp["positional_embedding"][:T]
        x = jnp.pad(x, ((0, Tp - T), (0, DM - d_model))).astype(jnp.float32)

        args = (x,) + tuple(kp[n] for n in _WEIGHT_ORDER)
        in_specs = [_full_spec(a.shape) for a in args]
        out_shape = (jax.ShapeDtypeStruct((Tp, NC), jnp.float32),
                     jax.ShapeDtypeStruct((L, Tp, Tp), jnp.float32))
        out_specs = (_full_spec((Tp, NC)), _full_spec((L, Tp, Tp)))

        logits_pad, attn_pad = pl.pallas_call(
            kernel,
            grid=(1,),
            in_specs=in_specs,
            out_specs=out_specs,
            out_shape=out_shape,
            compiler_params=pltpu.CompilerParams(
                dimension_semantics=("arbitrary",)),
        )(*args)

        logits = logits_pad[:T, :num_classes]
        attention_maps = [attn_pad[i, :T, :T] for i in range(L)]
        return logits, attention_maps

    return forward


# ------------------------------- main ---------------------------------------


if __name__ == "__main__":
    vocab_size, d_model, d_internal = 27, 90, 75
    num_classes, num_layers, num_positions = 3, 2, 20
    T = 20  # sequence length (== num_positions, like the letter-counting task)

    key = jax.random.PRNGKey(0)
    k_params, k_idx = jax.random.split(key)
    params = init_params(k_params, vocab_size, d_model, d_internal,
                         num_classes, num_layers, num_positions)
    indices = jax.random.randint(k_idx, (T,), 0, vocab_size, dtype=jnp.int32)

    kparams, cfg = prepare_params(params, T)
    forward = make_forward(cfg)

    logits, attention_maps = forward(indices, kparams)
    jax.block_until_ready(logits)
    for a in attention_maps:
        jax.block_until_ready(a)

    assert logits.shape == (T, num_classes)
    assert len(attention_maps) == num_layers
    assert all(a.shape == (T, T) for a in attention_maps)
    assert bool(jnp.all(jnp.isfinite(logits)))
    # torch.nn.Softmax(0) semantics: each attention-map column sums to 1.
    for a in attention_maps:
        col_sums = jnp.sum(a, axis=0)
        assert bool(jnp.all(jnp.abs(col_sums - 1.0) < 1e-3))
    print("KERNEL_OK")
</pallas_src>

<mosaic_0001>
module attributes {stable_mosaic.version = 11 : i64} {
  func.func @fused_transformer_kernel(%arg0: i32, %arg1: memref<32x128xf32, #tpu.memory_space<vmem>>, %arg2: memref<2x128x128xbf16, #tpu.memory_space<vmem>>, %arg3: memref<2x1x128xf32, #tpu.memory_space<vmem>>, %arg4: memref<2x128x128xbf16, #tpu.memory_space<vmem>>, %arg5: memref<2x1x128xf32, #tpu.memory_space<vmem>>, %arg6: memref<2x128x128xbf16, #tpu.memory_space<vmem>>, %arg7: memref<2x1x128xf32, #tpu.memory_space<vmem>>, %arg8: memref<2x128x128xbf16, #tpu.memory_space<vmem>>, %arg9: memref<2x1x128xf32, #tpu.memory_space<vmem>>, %arg10: memref<2x128x256xbf16, #tpu.memory_space<vmem>>, %arg11: memref<2x1x256xf32, #tpu.memory_space<vmem>>, %arg12: memref<2x256x128xbf16, #tpu.memory_space<vmem>>, %arg13: memref<2x1x128xf32, #tpu.memory_space<vmem>>, %arg14: memref<128x128xbf16, #tpu.memory_space<vmem>>, %arg15: memref<1x128xf32, #tpu.memory_space<vmem>>, %arg16: memref<32x128xf32, #tpu.memory_space<vmem>>, %arg17: memref<2x32x32xf32, #tpu.memory_space<vmem>>) attributes {dimension_semantics = [#tpu.dimension_semantics<arbitrary>], iteration_bounds = array<i64: 1>, scalar_prefetch = 0 : i64, scratch_operands = 0 : i64, tpu.core_type = #tpu.core_type<tc>, window_params = [{pipeline_mode = #tpu.pipeline_mode<synchronous>, transform_indices = @transform_0, window_bounds = array<i64: 32, 128>}, {pipeline_mode = #tpu.pipeline_mode<synchronous>, transform_indices = @transform_1, window_bounds = array<i64: 2, 128, 128>}, {pipeline_mode = #tpu.pipeline_mode<synchronous>, transform_indices = @transform_2, window_bounds = array<i64: 2, 1, 128>}, {pipeline_mode = #tpu.pipeline_mode<synchronous>, transform_indices = @transform_3, window_bounds = array<i64: 2, 128, 128>}, {pipeline_mode = #tpu.pipeline_mode<synchronous>, transform_indices = @transform_4, window_bounds = array<i64: 2, 1, 128>}, {pipeline_mode = #tpu.pipeline_mode<synchronous>, transform_indices = @transform_5, window_bounds = array<i64: 2, 128, 128>}, {pipeline_mode = #tpu.pipeline_mode<synchronous>, transform_indices = @transform_6, window_bounds = array<i64: 2, 1, 128>}, {pipeline_mode = #tpu.pipeline_mode<synchronous>, transform_indices = @transform_7, window_bounds = array<i64: 2, 128, 128>}, {pipeline_mode = #tpu.pipeline_mode<synchronous>, transform_indices = @transform_8, window_bounds = array<i64: 2, 1, 128>}, {pipeline_mode = #tpu.pipeline_mode<synchronous>, transform_indices = @transform_9, window_bounds = array<i64: 2, 128, 256>}, {pipeline_mode = #tpu.pipeline_mode<synchronous>, transform_indices = @transform_10, window_bounds = array<i64: 2, 1, 256>}, {pipeline_mode = #tpu.pipeline_mode<synchronous>, transform_indices = @transform_11, window_bounds = array<i64: 2, 256, 128>}, {pipeline_mode = #tpu.pipeline_mode<synchronous>, transform_indices = @transform_12, window_bounds = array<i64: 2, 1, 128>}, {pipeline_mode = #tpu.pipeline_mode<synchronous>, transform_indices = @transform_13, window_bounds = array<i64: 128, 128>}, {pipeline_mode = #tpu.pipeline_mode<synchronous>, transform_indices = @transform_14, window_bounds = array<i64: 1, 128>}, {pipeline_mode = #tpu.pipeline_mode<synchronous>, transform_indices = @transform_15, window_bounds = array<i64: 32, 128>}, {pipeline_mode = #tpu.pipeline_mode<synchronous>, transform_indices = @transform_16, window_bounds = array<i64: 2, 32, 32>}]} {
    %0 = tpu.iota {dimensions = array<i32: 0>} : vector<32x32xi32>
    %c20_i32 = arith.constant 20 : i32
    %1 = vector.broadcast %c20_i32 : i32 to vector<32x32xi32>
    %2 = arith.cmpi slt, %0, %1 : vector<32x32xi32>
    %3 = tpu.iota {dimensions = array<i32: 1>} : vector<32x32xi32>
    %c20_i32_0 = arith.constant 20 : i32
    %4 = vector.broadcast %c20_i32_0 : i32 to vector<32x32xi32>
    %5 = arith.cmpi slt, %3, %4 : vector<32x32xi32>
    %c0 = arith.constant 0 : index
    %c0_1 = arith.constant 0 : index
    %6 = vector.load %arg1[%c0, %c0_1] : memref<32x128xf32, #tpu.memory_space<vmem>>, vector<32x128xf32>
    %7 = arith.truncf %6 : vector<32x128xf32> to vector<32x128xbf16>
    %c0_2 = arith.constant 0 : index
    %c0_3 = arith.constant 0 : index
    %c0_4 = arith.constant 0 : index
    %8 = vector.load %arg2[%c0_2, %c0_3, %c0_4] : memref<2x128x128xbf16, #tpu.memory_space<vmem>>, vector<1x128x128xbf16>
    %9 = vector.shape_cast %8 : vector<1x128x128xbf16> to vector<128x128xbf16>
    %cst = arith.constant dense<0.000000e+00> : vector<32x128xf32>
    %10 = tpu.matmul %7, %9, %cst {dimension_numbers = #tpu.dot_dimension_numbers<[1], [0], [0], [1], [0, 0, 1, 1], [], []>} : vector<32x128xbf16>, vector<128x128xbf16>, vector<32x128xf32> -> vector<32x128xf32>
    %c0_5 = arith.constant 0 : index
    %c0_6 = arith.constant 0 : index
    %c0_7 = arith.constant 0 : index
    %11 = vector.load %arg3[%c0_5, %c0_6, %c0_7] : memref<2x1x128xf32, #tpu.memory_space<vmem>>, vector<1x1x128xf32>
    %12 = vector.shape_cast %11 : vector<1x1x128xf32> to vector<1x128xf32>
    %13 = vector.broadcast %12 : vector<1x128xf32> to vector<32x128xf32>
    %14 = arith.addf %10, %13 : vector<32x128xf32>
    %c0_8 = arith.constant 0 : index
    %c0_9 = arith.constant 0 : index
    %c0_10 = arith.constant 0 : index
    %15 = vector.load %arg4[%c0_8, %c0_9, %c0_10] : memref<2x128x128xbf16, #tpu.memory_space<vmem>>, vector<1x128x128xbf16>
    %16 = vector.shape_cast %15 : vector<1x128x128xbf16> to vector<128x128xbf16>
    %cst_11 = arith.constant dense<0.000000e+00> : vector<32x128xf32>
    %17 = tpu.matmul %7, %16, %cst_11 {dimension_numbers = #tpu.dot_dimension_numbers<[1], [0], [0], [1], [0, 0, 1, 1], [], []>} : vector<32x128xbf16>, vector<128x128xbf16>, vector<32x128xf32> -> vector<32x128xf32>
    %c0_12 = arith.constant 0 : index
    %c0_13 = arith.constant 0 : index
    %c0_14 = arith.constant 0 : index
    %18 = vector.load %arg5[%c0_12, %c0_13, %c0_14] : memref<2x1x128xf32, #tpu.memory_space<vmem>>, vector<1x1x128xf32>
    %19 = vector.shape_cast %18 : vector<1x1x128xf32> to vector<1x128xf32>
    %20 = vector.broadcast %19 : vector<1x128xf32> to vector<32x128xf32>
    %21 = arith.addf %17, %20 : vector<32x128xf32>
    %c0_15 = arith.constant 0 : index
    %c0_16 = arith.constant 0 : index
    %c0_17 = arith.constant 0 : index
    %22 = vector.load %arg6[%c0_15, %c0_16, %c0_17] : memref<2x128x128xbf16, #tpu.memory_space<vmem>>, vector<1x128x128xbf16>
    %23 = vector.shape_cast %22 : vector<1x128x128xbf16> to vector<128x128xbf16>
    %cst_18 = arith.constant dense<0.000000e+00> : vector<32x128xf32>
    %24 = tpu.matmul %7, %23, %cst_18 {dimension_numbers = #tpu.dot_dimension_numbers<[1], [0], [0], [1], [0, 0, 1, 1], [], []>} : vector<32x128xbf16>, vector<128x128xbf16>, vector<32x128xf32> -> vector<32x128xf32>
    %c0_19 = arith.constant 0 : index
    %c0_20 = arith.constant 0 : index
    %c0_21 = arith.constant 0 : index
    %25 = vector.load %arg7[%c0_19, %c0_20, %c0_21] : memref<2x1x128xf32, #tpu.memory_space<vmem>>, vector<1x1x128xf32>
    %26 = vector.shape_cast %25 : vector<1x1x128xf32> to vector<1x128xf32>
    %27 = vector.broadcast %26 : vector<1x128xf32> to vector<32x128xf32>
    %28 = arith.addf %24, %27 : vector<32x128xf32>
    %29 = arith.truncf %14 : vector<32x128xf32> to vector<32x128xbf16>
    %30 = arith.truncf %21 : vector<32x128xf32> to vector<32x128xbf16>
    %cst_22 = arith.constant dense<0.000000e+00> : vector<32x32xf32>
    %31 = tpu.matmul %29, %30, %cst_22 {dimension_numbers = #tpu.dot_dimension_numbers<[1], [1], [0], [0], [0, 0, 1, 0], [], []>} : vector<32x128xbf16>, vector<32x128xbf16>, vector<32x32xf32> -> vector<32x32xf32>
    %cst_23 = arith.constant -1.000000e+30 : f32
    %32 = vector.broadcast %cst_23 : f32 to vector<32x32xf32>
    %33 = arith.select %2, %31, %32 : vector<32x32xi1>, vector<32x32xf32>
    %cst_24 = arith.constant dense<0xFF800000> : vector<32xf32>
    %34 = vector.multi_reduction <maximumf>, %33, %cst_24 [0] : vector<32x32xf32> to vector<32xf32>
    %35 = vector.shape_cast %34 : vector<32xf32> to vector<1x32xf32>
    %36 = vector.broadcast %35 : vector<1x32xf32> to vector<32x32xf32>
    %37 = arith.subf %33, %36 : vector<32x32xf32>
    %38 = math.exp %37 : vector<32x32xf32>
    %cst_25 = arith.constant dense<0.000000e+00> : vector<32xf32>
    %39 = vector.multi_reduction <add>, %38, %cst_25 [0] : vector<32x32xf32> to vector<32xf32>
    %40 = vector.shape_cast %39 : vector<32xf32> to vector<1x32xf32>
    %41 = vector.broadcast %40 : vector<1x32xf32> to vector<32x32xf32>
    %42 = arith.divf %38, %41 : vector<32x32xf32>
    %cst_26 = arith.constant 0.000000e+00 : f32
    %43 = vector.broadcast %cst_26 : f32 to vector<32x32xf32>
    %44 = arith.select %5, %42, %43 : vector<32x32xi1>, vector<32x32xf32>
    %c0_27 = arith.constant 0 : index
    %c0_28 = arith.constant 0 : index
    %c0_29 = arith.constant 0 : index
    %45 = vector.load %arg17[%c0_27, %c0_28, %c0_29] : memref<2x32x32xf32, #tpu.memory_space<vmem>>, vector<1x32x32xf32>
    %46 = vector.shape_cast %45 : vector<1x32x32xf32> to vector<32x32xf32>
    %47 = vector.shape_cast %44 : vector<32x32xf32> to vector<1x32x32xf32>
    tpu.vector_store %arg17[%c0_27, %c0_28, %c0_29], %47 {strides = array<i32>} : memref<2x32x32xf32, #tpu.memory_space<vmem>>, vector<1x32x32xf32>,
    %48 = arith.truncf %44 : vector<32x32xf32> to vector<32x32xbf16>
    %49 = arith.truncf %28 : vector<32x128xf32> to vector<32x128xbf16>
    %cst_30 = arith.constant dense<0.000000e+00> : vector<32x128xf32>
    %50 = tpu.matmul %48, %49, %cst_30 {dimension_numbers = #tpu.dot_dimension_numbers<[1], [0], [0], [1], [0, 0, 1, 1], [], []>} : vector<32x32xbf16>, vector<32x128xbf16>, vector<32x128xf32> -> vector<32x128xf32>
    %51 = arith.truncf %50 : vector<32x128xf32> to vector<32x128xbf16>
    %c0_31 = arith.constant 0 : index
    %c0_32 = arith.constant 0 : index
    %c0_33 = arith.constant 0 : index
    %52 = vector.load %arg8[%c0_31, %c0_32, %c0_33] : memref<2x128x128xbf16, #tpu.memory_space<vmem>>, vector<1x128x128xbf16>
    %53 = vector.shape_cast %52 : vector<1x128x128xbf16> to vector<128x128xbf16>
    %cst_34 = arith.constant dense<0.000000e+00> : vector<32x128xf32>
    %54 = tpu.matmul %51, %53, %cst_34 {dimension_numbers = #tpu.dot_dimension_numbers<[1], [0], [0], [1], [0, 0, 1, 1], [], []>} : vector<32x128xbf16>, vector<128x128xbf16>, vector<32x128xf32> -> vector<32x128xf32>
    %c0_35 = arith.constant 0 : index
    %c0_36 = arith.constant 0 : index
    %c0_37 = arith.constant 0 : index
    %55 = vector.load %arg9[%c0_35, %c0_36, %c0_37] : memref<2x1x128xf32, #tpu.memory_space<vmem>>, vector<1x1x128xf32>
    %56 = vector.shape_cast %55 : vector<1x1x128xf32> to vector<1x128xf32>
    %57 = vector.broadcast %56 : vector<1x128xf32> to vector<32x128xf32>
    %58 = arith.addf %54, %57 : vector<32x128xf32>
    %59 = arith.addf %58, %6 : vector<32x128xf32>
    %60 = arith.truncf %59 : vector<32x128xf32> to vector<32x128xbf16>
    %c0_38 = arith.constant 0 : index
    %c0_39 = arith.constant 0 : index
    %c0_40 = arith.constant 0 : index
    %61 = vector.load %arg10[%c0_38, %c0_39, %c0_40] : memref<2x128x256xbf16, #tpu.memory_space<vmem>>, vector<1x128x256xbf16>
    %62 = vector.shape_cast %61 : vector<1x128x256xbf16> to vector<128x256xbf16>
    %cst_41 = arith.constant dense<0.000000e+00> : vector<32x256xf32>
    %63 = tpu.matmul %60, %62, %cst_41 {dimension_numbers = #tpu.dot_dimension_numbers<[1], [0], [0], [1], [0, 0, 1, 1], [], []>} : vector<32x128xbf16>, vector<128x256xbf16>, vector<32x256xf32> -> vector<32x256xf32>
    %c0_42 = arith.constant 0 : index
    %c0_43 = arith.constant 0 : index
    %c0_44 = arith.constant 0 : index
    %64 = vector.load %arg11[%c0_42, %c0_43, %c0_44] : memref<2x1x256xf32, #tpu.memory_space<vmem>>, vector<1x1x256xf32>
    %65 = vector.shape_cast %64 : vector<1x1x256xf32> to vector<1x256xf32>
    %66 = vector.broadcast %65 : vector<1x256xf32> to vector<32x256xf32>
    %67 = arith.addf %63, %66 : vector<32x256xf32>
    %cst_45 = arith.constant 0.000000e+00 : f32
    %68 = vector.broadcast %cst_45 : f32 to vector<32x256xf32>
    %69 = arith.maximumf %67, %68 : vector<32x256xf32>
    %70 = arith.truncf %69 : vector<32x256xf32> to vector<32x256xbf16>
    %c0_46 = arith.constant 0 : index
    %c0_47 = arith.constant 0 : index
    %c0_48 = arith.constant 0 : index
    %71 = vector.load %arg12[%c0_46, %c0_47, %c0_48] : memref<2x256x128xbf16, #tpu.memory_space<vmem>>, vector<1x256x128xbf16>
    %72 = vector.shape_cast %71 : vector<1x256x128xbf16> to vector<256x128xbf16>
    %cst_49 = arith.constant dense<0.000000e+00> : vector<32x128xf32>
    %73 = tpu.matmul %70, %72, %cst_49 {dimension_numbers = #tpu.dot_dimension_numbers<[1], [0], [0], [1], [0, 0, 1, 1], [], []>} : vector<32x256xbf16>, vector<256x128xbf16>, vector<32x128xf32> -> vector<32x128xf32>
    %c0_50 = arith.constant 0 : index
    %c0_51 = arith.constant 0 : index
    %c0_52 = arith.constant 0 : index
    %74 = vector.load %arg13[%c0_50, %c0_51, %c0_52] : memref<2x1x128xf32, #tpu.memory_space<vmem>>, vector<1x1x128xf32>
    %75 = vector.shape_cast %74 : vector<1x1x128xf32> to vector<1x128xf32>
    %76 = vector.broadcast %75 : vector<1x128xf32> to vector<32x128xf32>
    %77 = arith.addf %73, %76 : vector<32x128xf32>
    %78 = arith.addf %77, %59 : vector<32x128xf32>
    %79 = arith.truncf %78 : vector<32x128xf32> to vector<32x128xbf16>
    %c1 = arith.constant 1 : index
    %c0_53 = arith.constant 0 : index
    %c0_54 = arith.constant 0 : index
    %80 = vector.load %arg2[%c1, %c0_53, %c0_54] : memref<2x128x128xbf16, #tpu.memory_space<vmem>>, vector<1x128x128xbf16>
    %81 = vector.shape_cast %80 : vector<1x128x128xbf16> to vector<128x128xbf16>
    %cst_55 = arith.constant dense<0.000000e+00> : vector<32x128xf32>
    %82 = tpu.matmul %79, %81, %cst_55 {dimension_numbers = #tpu.dot_dimension_numbers<[1], [0], [0], [1], [0, 0, 1, 1], [], []>} : vector<32x128xbf16>, vector<128x128xbf16>, vector<32x128xf32> -> vector<32x128xf32>
    %c1_56 = arith.constant 1 : index
    %c0_57 = arith.constant 0 : index
    %c0_58 = arith.constant 0 : index
    %83 = vector.load %arg3[%c1_56, %c0_57, %c0_58] : memref<2x1x128xf32, #tpu.memory_space<vmem>>, vector<1x1x128xf32>
    %84 = vector.shape_cast %83 : vector<1x1x128xf32> to vector<1x128xf32>
    %85 = vector.broadcast %84 : vector<1x128xf32> to vector<32x128xf32>
    %86 = arith.addf %82, %85 : vector<32x128xf32>
    %c1_59 = arith.constant 1 : index
    %c0_60 = arith.constant 0 : index
    %c0_61 = arith.constant 0 : index
    %87 = vector.load %arg4[%c1_59, %c0_60, %c0_61] : memref<2x128x128xbf16, #tpu.memory_space<vmem>>, vector<1x128x128xbf16>
    %88 = vector.shape_cast %87 : vector<1x128x128xbf16> to vector<128x128xbf16>
    %cst_62 = arith.constant dense<0.000000e+00> : vector<32x128xf32>
    %89 = tpu.matmul %79, %88, %cst_62 {dimension_numbers = #tpu.dot_dimension_numbers<[1], [0], [0], [1], [0, 0, 1, 1], [], []>} : vector<32x128xbf16>, vector<128x128xbf16>, vector<32x128xf32> -> vector<32x128xf32>
    %c1_63 = arith.constant 1 : index
    %c0_64 = arith.constant 0 : index
    %c0_65 = arith.constant 0 : index
    %90 = vector.load %arg5[%c1_63, %c0_64, %c0_65] : memref<2x1x128xf32, #tpu.memory_space<vmem>>, vector<1x1x128xf32>
    %91 = vector.shape_cast %90 : vector<1x1x128xf32> to vector<1x128xf32>
    %92 = vector.broadcast %91 : vector<1x128xf32> to vector<32x128xf32>
    %93 = arith.addf %89, %92 : vector<32x128xf32>
    %c1_66 = arith.constant 1 : index
    %c0_67 = arith.constant 0 : index
    %c0_68 = arith.constant 0 : index
    %94 = vector.load %arg6[%c1_66, %c0_67, %c0_68] : memref<2x128x128xbf16, #tpu.memory_space<vmem>>, vector<1x128x128xbf16>
    %95 = vector.shape_cast %94 : vector<1x128x128xbf16> to vector<128x128xbf16>
    %cst_69 = arith.constant dense<0.000000e+00> : vector<32x128xf32>
    %96 = tpu.matmul %79, %95, %cst_69 {dimension_numbers = #tpu.dot_dimension_numbers<[1], [0], [0], [1], [0, 0, 1, 1], [], []>} : vector<32x128xbf16>, vector<128x128xbf16>, vector<32x128xf32> -> vector<32x128xf32>
    %c1_70 = arith.constant 1 : index
    %c0_71 = arith.constant 0 : index
    %c0_72 = arith.constant 0 : index
    %97 = vector.load %arg7[%c1_70, %c0_71, %c0_72] : memref<2x1x128xf32, #tpu.memory_space<vmem>>, vector<1x1x128xf32>
    %98 = vector.shape_cast %97 : vector<1x1x128xf32> to vector<1x128xf32>
    %99 = vector.broadcast %98 : vector<1x128xf32> to vector<32x128xf32>
    %100 = arith.addf %96, %99 : vector<32x128xf32>
    %101 = arith.truncf %86 : vector<32x128xf32> to vector<32x128xbf16>
    %102 = arith.truncf %93 : vector<32x128xf32> to vector<32x128xbf16>
    %cst_73 = arith.constant dense<0.000000e+00> : vector<32x32xf32>
    %103 = tpu.matmul %101, %102, %cst_73 {dimension_numbers = #tpu.dot_dimension_numbers<[1], [1], [0], [0], [0, 0, 1, 0], [], []>} : vector<32x128xbf16>, vector<32x128xbf16>, vector<32x32xf32> -> vector<32x32xf32>
    %cst_74 = arith.constant -1.000000e+30 : f32
    %104 = vector.broadcast %cst_74 : f32 to vector<32x32xf32>
    %105 = arith.select %2, %103, %104 : vector<32x32xi1>, vector<32x32xf32>
    %cst_75 = arith.constant dense<0xFF800000> : vector<32xf32>
    %106 = vector.multi_reduction <maximumf>, %105, %cst_75 [0] : vector<32x32xf32> to vector<32xf32>
    %107 = vector.shape_cast %106 : vector<32xf32> to vector<1x32xf32>
    %108 = vector.broadcast %107 : vector<1x32xf32> to vector<32x32xf32>
    %109 = arith.subf %105, %108 : vector<32x32xf32>
    %110 = math.exp %109 : vector<32x32xf32>
    %cst_76 = arith.constant dense<0.000000e+00> : vector<32xf32>
    %111 = vector.multi_reduction <add>, %110, %cst_76 [0] : vector<32x32xf32> to vector<32xf32>
    %112 = vector.shape_cast %111 : vector<32xf32> to vector<1x32xf32>
    %113 = vector.broadcast %112 : vector<1x32xf32> to vector<32x32xf32>
    %114 = arith.divf %110, %113 : vector<32x32xf32>
    %cst_77 = arith.constant 0.000000e+00 : f32
    %115 = vector.broadcast %cst_77 : f32 to vector<32x32xf32>
    %116 = arith.select %5, %114, %115 : vector<32x32xi1>, vector<32x32xf32>
    %c1_78 = arith.constant 1 : index
    %c0_79 = arith.constant 0 : index
    %c0_80 = arith.constant 0 : index
    %117 = vector.load %arg17[%c1_78, %c0_79, %c0_80] : memref<2x32x32xf32, #tpu.memory_space<vmem>>, vector<1x32x32xf32>
    %118 = vector.shape_cast %117 : vector<1x32x32xf32> to vector<32x32xf32>
    %119 = vector.shape_cast %116 : vector<32x32xf32> to vector<1x32x32xf32>
    tpu.vector_store %arg17[%c1_78, %c0_79, %c0_80], %119 {strides = array<i32>} : memref<2x32x32xf32, #tpu.memory_space<vmem>>, vector<1x32x32xf32>,
    %120 = arith.truncf %116 : vector<32x32xf32> to vector<32x32xbf16>
    %121 = arith.truncf %100 : vector<32x128xf32> to vector<32x128xbf16>
    %cst_81 = arith.constant dense<0.000000e+00> : vector<32x128xf32>
    %122 = tpu.matmul %120, %121, %cst_81 {dimension_numbers = #tpu.dot_dimension_numbers<[1], [0], [0], [1], [0, 0, 1, 1], [], []>} : vector<32x32xbf16>, vector<32x128xbf16>, vector<32x128xf32> -> vector<32x128xf32>
    %123 = arith.truncf %122 : vector<32x128xf32> to vector<32x128xbf16>
    %c1_82 = arith.constant 1 : index
    %c0_83 = arith.constant 0 : index
    %c0_84 = arith.constant 0 : index
    %124 = vector.load %arg8[%c1_82, %c0_83, %c0_84] : memref<2x128x128xbf16, #tpu.memory_space<vmem>>, vector<1x128x128xbf16>
    %125 = vector.shape_cast %124 : vector<1x128x128xbf16> to vector<128x128xbf16>
    %cst_85 = arith.constant dense<0.000000e+00> : vector<32x128xf32>
    %126 = tpu.matmul %123, %125, %cst_85 {dimension_numbers = #tpu.dot_dimension_numbers<[1], [0], [0], [1], [0, 0, 1, 1], [], []>} : vector<32x128xbf16>, vector<128x128xbf16>, vector<32x128xf32> -> vector<32x128xf32>
    %c1_86 = arith.constant 1 : index
    %c0_87 = arith.constant 0 : index
    %c0_88 = arith.constant 0 : index
    %127 = vector.load %arg9[%c1_86, %c0_87, %c0_88] : memref<2x1x128xf32, #tpu.memory_space<vmem>>, vector<1x1x128xf32>
    %128 = vector.shape_cast %127 : vector<1x1x128xf32> to vector<1x128xf32>
    %129 = vector.broadcast %128 : vector<1x128xf32> to vector<32x128xf32>
    %130 = arith.addf %126, %129 : vector<32x128xf32>
    %131 = arith.addf %130, %78 : vector<32x128xf32>
    %132 = arith.truncf %131 : vector<32x128xf32> to vector<32x128xbf16>
    %c1_89 = arith.constant 1 : index
    %c0_90 = arith.constant 0 : index
    %c0_91 = arith.constant 0 : index
    %133 = vector.load %arg10[%c1_89, %c0_90, %c0_91] : memref<2x128x256xbf16, #tpu.memory_space<vmem>>, vector<1x128x256xbf16>
    %134 = vector.shape_cast %133 : vector<1x128x256xbf16> to vector<128x256xbf16>
    %cst_92 = arith.constant dense<0.000000e+00> : vector<32x256xf32>
    %135 = tpu.matmul %132, %134, %cst_92 {dimension_numbers = #tpu.dot_dimension_numbers<[1], [0], [0], [1], [0, 0, 1, 1], [], []>} : vector<32x128xbf16>, vector<128x256xbf16>, vector<32x256xf32> -> vector<32x256xf32>
    %c1_93 = arith.constant 1 : index
    %c0_94 = arith.constant 0 : index
    %c0_95 = arith.constant 0 : index
    %136 = vector.load %arg11[%c1_93, %c0_94, %c0_95] : memref<2x1x256xf32, #tpu.memory_space<vmem>>, vector<1x1x256xf32>
    %137 = vector.shape_cast %136 : vector<1x1x256xf32> to vector<1x256xf32>
    %138 = vector.broadcast %137 : vector<1x256xf32> to vector<32x256xf32>
    %139 = arith.addf %135, %138 : vector<32x256xf32>
    %cst_96 = arith.constant 0.000000e+00 : f32
    %140 = vector.broadcast %cst_96 : f32 to vector<32x256xf32>
    %141 = arith.maximumf %139, %140 : vector<32x256xf32>
    %142 = arith.truncf %141 : vector<32x256xf32> to vector<32x256xbf16>
    %c1_97 = arith.constant 1 : index
    %c0_98 = arith.constant 0 : index
    %c0_99 = arith.constant 0 : index
    %143 = vector.load %arg12[%c1_97, %c0_98, %c0_99] : memref<2x256x128xbf16, #tpu.memory_space<vmem>>, vector<1x256x128xbf16>
    %144 = vector.shape_cast %143 : vector<1x256x128xbf16> to vector<256x128xbf16>
    %cst_100 = arith.constant dense<0.000000e+00> : vector<32x128xf32>
    %145 = tpu.matmul %142, %144, %cst_100 {dimension_numbers = #tpu.dot_dimension_numbers<[1], [0], [0], [1], [0, 0, 1, 1], [], []>} : vector<32x256xbf16>, vector<256x128xbf16>, vector<32x128xf32> -> vector<32x128xf32>
    %c1_101 = arith.constant 1 : index
    %c0_102 = arith.constant 0 : index
    %c0_103 = arith.constant 0 : index
    %146 = vector.load %arg13[%c1_101, %c0_102, %c0_103] : memref<2x1x128xf32, #tpu.memory_space<vmem>>, vector<1x1x128xf32>
    %147 = vector.shape_cast %146 : vector<1x1x128xf32> to vector<1x128xf32>
    %148 = vector.broadcast %147 : vector<1x128xf32> to vector<32x128xf32>
    %149 = arith.addf %145, %148 : vector<32x128xf32>
    %150 = arith.addf %149, %131 : vector<32x128xf32>
    %151 = arith.truncf %150 : vector<32x128xf32> to vector<32x128xbf16>
    %c0_104 = arith.constant 0 : index
    %c0_105 = arith.constant 0 : index
    %152 = vector.load %arg14[%c0_104, %c0_105] : memref<128x128xbf16, #tpu.memory_space<vmem>>, vector<128x128xbf16>
    %cst_106 = arith.constant dense<0.000000e+00> : vector<32x128xf32>
    %153 = tpu.matmul %151, %152, %cst_106 {dimension_numbers = #tpu.dot_dimension_numbers<[1], [0], [0], [1], [0, 0, 1, 1], [], []>} : vector<32x128xbf16>, vector<128x128xbf16>, vector<32x128xf32> -> vector<32x128xf32>
    %c0_107 = arith.constant 0 : index
    %c0_108 = arith.constant 0 : index
    %154 = vector.load %arg15[%c0_107, %c0_108] : memref<1x128xf32, #tpu.memory_space<vmem>>, vector<1x128xf32>
    %155 = vector.broadcast %154 : vector<1x128xf32> to vector<32x128xf32>
    %156 = arith.addf %153, %155 : vector<32x128xf32>
    %c0_109 = arith.constant 0 : index
    %c0_110 = arith.constant 0 : index
    %157 = vector.load %arg16[%c0_109, %c0_110] : memref<32x128xf32, #tpu.memory_space<vmem>>, vector<32x128xf32>
    tpu.vector_store %arg16[%c0_109, %c0_110], %156 {strides = array<i32>} : memref<32x128xf32, #tpu.memory_space<vmem>>, vector<32x128xf32>,
    return
  }
  func.func @transform_0(%arg0: i32) -> (i32, i32) {
    %c0_i32 = arith.constant 0 : i32
    %c0_i32_0 = arith.constant 0 : i32
    %c0_i32_1 = arith.constant 0 : i32
    return %c0_i32, %c0_i32_0 : i32, i32
  }
  func.func @transform_1(%arg0: i32) -> (i32, i32, i32) {
    %c0_i32 = arith.constant 0 : i32
    %c0_i32_0 = arith.constant 0 : i32
    %c0_i32_1 = arith.constant 0 : i32
    %c0_i32_2 = arith.constant 0 : i32
    return %c0_i32, %c0_i32_0, %c0_i32_1 : i32, i32, i32
  }
  func.func @transform_2(%arg0: i32) -> (i32, i32, i32) {
    %c0_i32 = arith.constant 0 : i32
    %c0_i32_0 = arith.constant 0 : i32
    %c0_i32_1 = arith.constant 0 : i32
    %c0_i32_2 = arith.constant 0 : i32
    return %c0_i32, %c0_i32_0, %c0_i32_1 : i32, i32, i32
  }
  func.func @transform_3(%arg0: i32) -> (i32, i32, i32) {
    %c0_i32 = arith.constant 0 : i32
    %c0_i32_0 = arith.constant 0 : i32
    %c0_i32_1 = arith.constant 0 : i32
    %c0_i32_2 = arith.constant 0 : i32
    return %c0_i32, %c0_i32_0, %c0_i32_1 : i32, i32, i32
  }
  func.func @transform_4(%arg0: i32) -> (i32, i32, i32) {
    %c0_i32 = arith.constant 0 : i32
    %c0_i32_0 = arith.constant 0 : i32
    %c0_i32_1 = arith.constant 0 : i32
    %c0_i32_2 = arith.constant 0 : i32
    return %c0_i32, %c0_i32_0, %c0_i32_1 : i32, i32, i32
  }
  func.func @transform_5(%arg0: i32) -> (i32, i32, i32) {
    %c0_i32 = arith.constant 0 : i32
    %c0_i32_0 = arith.constant 0 : i32
    %c0_i32_1 = arith.constant 0 : i32
    %c0_i32_2 = arith.constant 0 : i32
    return %c0_i32, %c0_i32_0, %c0_i32_1 : i32, i32, i32
  }
  func.func @transform_6(%arg0: i32) -> (i32, i32, i32) {
    %c0_i32 = arith.constant 0 : i32
    %c0_i32_0 = arith.constant 0 : i32
    %c0_i32_1 = arith.constant 0 : i32
    %c0_i32_2 = arith.constant 0 : i32
    return %c0_i32, %c0_i32_0, %c0_i32_1 : i32, i32, i32
  }
  func.func @transform_7(%arg0: i32) -> (i32, i32, i32) {
    %c0_i32 = arith.constant 0 : i32
    %c0_i32_0 = arith.constant 0 : i32
    %c0_i32_1 = arith.constant 0 : i32
    %c0_i32_2 = arith.constant 0 : i32
    return %c0_i32, %c0_i32_0, %c0_i32_1 : i32, i32, i32
  }
  func.func @transform_8(%arg0: i32) -> (i32, i32, i32) {
    %c0_i32 = arith.constant 0 : i32
    %c0_i32_0 = arith.constant 0 : i32
    %c0_i32_1 = arith.constant 0 : i32
    %c0_i32_2 = arith.constant 0 : i32
    return %c0_i32, %c0_i32_0, %c0_i32_1 : i32, i32, i32
  }
  func.func @transform_9(%arg0: i32) -> (i32, i32, i32) {
    %c0_i32 = arith.constant 0 : i32
    %c0_i32_0 = arith.constant 0 : i32
    %c0_i32_1 = arith.constant 0 : i32
    %c0_i32_2 = arith.constant 0 : i32
    return %c0_i32, %c0_i32_0, %c0_i32_1 : i32, i32, i32
  }
  func.func @transform_10(%arg0: i32) -> (i32, i32, i32) {
    %c0_i32 = arith.constant 0 : i32
    %c0_i32_0 = arith.constant 0 : i32
    %c0_i32_1 = arith.constant 0 : i32
    %c0_i32_2 = arith.constant 0 : i32
    return %c0_i32, %c0_i32_0, %c0_i32_1 : i32, i32, i32
  }
  func.func @transform_11(%arg0: i32) -> (i32, i32, i32) {
    %c0_i32 = arith.constant 0 : i32
    %c0_i32_0 = arith.constant 0 : i32
    %c0_i32_1 = arith.constant 0 : i32
    %c0_i32_2 = arith.constant 0 : i32
    return %c0_i32, %c0_i32_0, %c0_i32_1 : i32, i32, i32
  }
  func.func @transform_12(%arg0: i32) -> (i32, i32, i32) {
    %c0_i32 = arith.constant 0 : i32
    %c0_i32_0 = arith.constant 0 : i32
    %c0_i32_1 = arith.constant 0 : i32
    %c0_i32_2 = arith.constant 0 : i32
    return %c0_i32, %c0_i32_0, %c0_i32_1 : i32, i32, i32
  }
  func.func @transform_13(%arg0: i32) -> (i32, i32) {
    %c0_i32 = arith.constant 0 : i32
    %c0_i32_0 = arith.constant 0 : i32
    %c0_i32_1 = arith.constant 0 : i32
    return %c0_i32, %c0_i32_0 : i32, i32
  }
  func.func @transform_14(%arg0: i32) -> (i32, i32) {
    %c0_i32 = arith.constant 0 : i32
    %c0_i32_0 = arith.constant 0 : i32
    %c0_i32_1 = arith.constant 0 : i32
    return %c0_i32, %c0_i32_0 : i32, i32
  }
  func.func @transform_15(%arg0: i32) -> (i32, i32) {
    %c0_i32 = arith.constant 0 : i32
    %c0_i32_0 = arith.constant 0 : i32
    %c0_i32_1 = arith.constant 0 : i32
    return %c0_i32, %c0_i32_0 : i32, i32
  }
  func.func @transform_16(%arg0: i32) -> (i32, i32, i32) {
    %c0_i32 = arith.constant 0 : i32
    %c0_i32_0 = arith.constant 0 : i32
    %c0_i32_1 = arith.constant 0 : i32
    %c0_i32_2 = arith.constant 0 : i32
    return %c0_i32, %c0_i32_0, %c0_i32_1 : i32, i32, i32
  }
}

</mosaic_0001>

<bundles_post_ra>
// kernel: forward.1
= control target key start
LH: loop header
LB: loop body
LE: loop exit
PB: predicated region body
PF: predicated region fallthrough
CT: control target
= control target key end

     0   :  { %s3748_s0 = inlined_call_operand.vmem [shape: f32[32,128], index: 0, kind: input, shape index: {}]   ;;  %s3749_s1 = inlined_call_operand.vmem [shape: bf16[2,128,128], index: 1, kind: input, shape index: {}]   ;;  %s3750_s2 = inlined_call_operand.vmem [shape: f32[2,1,128], index: 2, kind: input, shape index: {}]   ;;  %s3751_s3 = inlined_call_operand.hbm [shape: bf16[2,128,128], index: 3, kind: input, shape index: {}]   ;;  %s3752_s4 = inlined_call_operand.vmem [shape: f32[2,1,128], index: 4, kind: input, shape index: {}]   ;;  %s3753_s5 = inlined_call_operand.hbm [shape: bf16[2,128,128], index: 5, kind: input, shape index: {}]   ;;  %s3754_s6 = inlined_call_operand.vmem [shape: f32[2,1,128], index: 6, kind: input, shape index: {}]   ;;  %s3755_s7 = inlined_call_operand.hbm [shape: bf16[2,128,128], index: 7, kind: input, shape index: {}]   ;;  %s3756_s8 = inlined_call_operand.vmem [shape: f32[2,1,128], index: 8, kind: input, shape index: {}]   ;;  %s3757_s9 = inlined_call_operand.vmem [shape: bf16[2,128,256], index: 9, kind: input, shape index: {}]   ;;  %s3758_s10 = inlined_call_operand.vmem [shape: f32[2,1,256], index: 10, kind: input, shape index: {}]   ;;  %s3759_s11 = inlined_call_operand.hbm [shape: bf16[2,256,128], index: 11, kind: input, shape index: {}]   ;;  %s3760_s12 = inlined_call_operand.vmem [shape: f32[2,1,128], index: 12, kind: input, shape index: {}]   ;;  %s3761_s13 = inlined_call_operand.hbm [shape: bf16[128,128], index: 13, kind: input, shape index: {}]   ;;  %s3762_s14 = inlined_call_operand.vmem [shape: f32[1,128], index: 14, kind: input, shape index: {}]   ;;  %s3763_s15 = inlined_call_operand.vmem [shape: f32[32,128], index: 15, kind: output, shape index: {0}]   ;;  %s3764_s16 = inlined_call_operand.vmem [shape: f32[2,32,32], index: 16, kind: output, shape index: {1}]  }
   0x1   :  { %3766 = sst [smem:[#allocation13_spill]] %s3748_s0 }
   0x2   :  { %22 = vsyncpa [#allocation3], 0 }
   0x3   :  { %23 = vsyncpa [#allocation5], 0 }
   0x4   :  { %24 = vsyncpa [#allocation8], 0  ;;  %s3188_s21 = smov [#allocation4]   ;;  %s3189_s23 = smov [#allocation7]  }
   0x5   :  { %s50_s22 = sshll.u32 %s3188_s21, 4  ;;  %s82_s24 = sshll.u32 %s3189_s23, 4  ;;  %s51_s22 = int_to_ptr.vmem [resolvable:$true] %s50_s22  ;;  %s3282_s24 = int_to_ptr.vmem [resolvable:$true] %s82_s24 }
   0x6   :  { %s3072_s27 = scalar_lea.hbm %s3753_s5, 2048 }
   0x7   :  { %p3073_p0 = scmp.ne.s32.totalorder %s3753_s5, %s3072_s27  ;;  %p3076_p1 = scmp.lt.u32.totalorder %s3072_s27, %s3753_s5 }
   0x9   :  { %p3078_p2 = pnand %p3076_p1, %p3073_p0 }
   0xb   :  { %3081 = shalt.err (!%p3078_p2)
}
   0xc   :  { %s3082_s17 = scalar_lea.vmem %s51_s22, 2048  ;;  %p3087_p4 = scmp.lt.s32.totalorder %s51_s22, %s51_s22 }
   0xd   :  { %p3083_p3 = scmp.ne.s32.totalorder %s51_s22, %s3082_s17  ;;  %p3088_p5 = scmp.lt.s32.totalorder %s3082_s17, %s3082_s17 }
   0xf   :  { %p3089_p6 = por %p3088_p5, %p3087_p4 }
  0x11   :  { %p3090_p7 = pnand %p3089_p6, %p3083_p3 }
  0x13   :  { %3093 = shalt.err (!%p3090_p7)
}
  0x14   :  { %s3190_s18 = smov 64   ;;  %s3191_s19 = smov 4  }
  0x15   :  { %56 = dma.hbm_to_vmem [thread:$0]  %s3753_s5, 2048, %s51_s22, [#allocation5], %s3190_s18, %s3190_s18, %s3191_s19  }
  0x16   :  { %s3094_s26 = scalar_lea.hbm %s3759_s11, 4096 }
  0x17   :  { %p3095_p8 = scmp.ne.s32.totalorder %s3759_s11, %s3094_s26  ;;  %p3098_p9 = scmp.lt.u32.totalorder %s3094_s26, %s3759_s11 }
  0x19   :  { %p3100_p10 = pnand %p3098_p9, %p3095_p8 }
  0x1b   :  { %3103 = shalt.err (!%p3100_p10)
}
  0x1c   :  { %s3104_s0 = scalar_lea.vmem %s3282_s24, 4096  ;;  %p3109_p12 = scmp.lt.s32.totalorder %s3282_s24, %s3282_s24 }
  0x1d   :  { %p3105_p11 = scmp.ne.s32.totalorder %s3282_s24, %s3104_s0  ;;  %p3110_p13 = scmp.lt.s32.totalorder %s3104_s0, %s3104_s0 }
  0x1f   :  { %p3111_p0 = por %p3110_p13, %p3109_p12 }
  0x21   :  { %p3112_p1 = pnand %p3111_p0, %p3105_p11 }
  0x23   :  { %3115 = shalt.err (!%p3112_p1)
}
  0x24   :  { %88 = dma.hbm_to_vmem [thread:$0]  %s3759_s11, 4096, %s3282_s24, [#allocation8], %s3190_s18, %s3190_s18, %s3191_s19  }
  0x25   :  { %s3192_s17 = smov [#allocation2]   ;;  %s3193_s21 = smov [#allocation6]  }
  0x26   :  { %s36_s20 = sshll.u32 %s3192_s17, 4  ;;  %s64_s23 = sshll.u32 %s3193_s21, 4  ;;  %s37_s20 = int_to_ptr.vmem [resolvable:$true] %s36_s20  ;;  %s3319_s23 = int_to_ptr.vmem [resolvable:$true] %s64_s23 }
  0x27   :  { %s3116_s27 = scalar_lea.hbm %s3751_s3, 2048 }
  0x28   :  { %p3117_p2 = scmp.ne.s32.totalorder %s3751_s3, %s3116_s27  ;;  %p3120_p3 = scmp.lt.u32.totalorder %s3116_s27, %s3751_s3 }
  0x2a   :  { %p3122_p4 = pnand %p3120_p3, %p3117_p2 }
  0x2c   :  { %3125 = shalt.err (!%p3122_p4)
}
  0x2d   :  { %s3126_s11 = scalar_lea.vmem %s37_s20, 2048  ;;  %p3131_p6 = scmp.lt.s32.totalorder %s37_s20, %s37_s20 }
  0x2e   :  { %p3127_p5 = scmp.ne.s32.totalorder %s37_s20, %s3126_s11  ;;  %p3132_p7 = scmp.lt.s32.totalorder %s3126_s11, %s3126_s11 }
  0x30   :  { %p3133_p8 = por %p3132_p7, %p3131_p6 }
  0x32   :  { %p3134_p9 = pnand %p3133_p8, %p3127_p5 }
  0x34   :  { %3137 = shalt.err (!%p3134_p9)
}
  0x35   :  { %42 = dma.hbm_to_vmem [thread:$0]  %s3751_s3, 2048, %s37_s20, [#allocation3], %s3190_s18, %s3190_s18, %s3191_s19  }
  0x36   :  { %s3138_s21 = scalar_lea.hbm %s3755_s7, 2048 }
  0x37   :  { %p3139_p10 = scmp.ne.s32.totalorder %s3755_s7, %s3138_s21  ;;  %p3142_p11 = scmp.lt.u32.totalorder %s3138_s21, %s3755_s7 }
  0x39   :  { %p3144_p12 = pnand %p3142_p11, %p3139_p10 }
  0x3b   :  { %3147 = shalt.err (!%p3144_p12)
}
  0x3c   :  { %s3148_s29 = scalar_lea.vmem %s3319_s23, 2048  ;;  %p3153_p0 = scmp.lt.s32.totalorder %s3319_s23, %s3319_s23 }
  0x3d   :  { %p3149_p13 = scmp.ne.s32.totalorder %s3319_s23, %s3148_s29  ;;  %p3154_p1 = scmp.lt.s32.totalorder %s3148_s29, %s3148_s29 }
  0x3f   :  { %p3155_p2 = por %p3154_p1, %p3153_p0 }
  0x41   :  { %p3156_p3 = pnand %p3155_p2, %p3149_p13 }
  0x43   :  { %3159 = shalt.err (!%p3156_p3)
}
  0x44   :  { %70 = dma.hbm_to_vmem [thread:$0]  %s3755_s7, 2048, %s3319_s23, [#allocation5], %s3190_s18, %s3190_s18, %s3191_s19  }
  0x45   :  { %s3194_s30 = smov [#allocation9]   ;;  %s3160_s5 = scalar_lea.hbm %s3761_s13, 1024 }
  0x46   :  { %s96_s0 = sshll.u32 %s3194_s30, 4  ;;  %p3161_p4 = scmp.ne.s32.totalorder %s3761_s13, %s3160_s5  ;;  %s97_s0 = int_to_ptr.vmem [resolvable:$true] %s96_s0 }
  0x47   :  { %p3164_p5 = scmp.lt.u32.totalorder %s3160_s5, %s3761_s13 }
  0x49   :  { %p3166_p6 = pnand %p3164_p5, %p3161_p4 }
  0x4b   :  { %3169 = shalt.err (!%p3166_p6)
}
  0x4c   :  { %s3170_s26 = scalar_lea.vmem %s97_s0, 1024  ;;  %p3175_p8 = scmp.lt.s32.totalorder %s97_s0, %s97_s0 }
  0x4d   :  { %p3171_p7 = scmp.ne.s32.totalorder %s97_s0, %s3170_s26  ;;  %p3176_p9 = scmp.lt.s32.totalorder %s3170_s26, %s3170_s26 }
  0x4f   :  { %p3177_p10 = por %p3176_p9, %p3175_p8 }
  0x51   :  { %p3178_p11 = pnand %p3177_p10, %p3171_p7 }
  0x53   :  { %3181 = shalt.err (!%p3178_p11)
}
  0x54   :  { %102 = dma.hbm_to_vmem [thread:$0]  %s3761_s13, 1024, %s97_s0, [#allocation8], %s3190_s18, %s3190_s18, %s3191_s19  }
  0x55   :  { %3182 = dma.done.wait [#allocation3], 2048  }
  0x56   :  { %3183 = vsyncadd [#allocation3], 4294965248 }
  0x57   :  { %3184 = dma.done.wait [#allocation5], 4096  }
  0x58   :  { %3185 = vsyncadd [#allocation5], 4294963200 }
  0x59   :  { %3186 = dma.done.wait [#allocation8], 5120  }
  0x5a   :  { %3187 = vsyncadd [#allocation8], 4294962176  ;;  %v2900_v0 = vld [vmem:[#allocation2] sm:$0xff]   ;;  %v2901_v1 = vld [vmem:[#allocation2 + $0x8] sm:$0xff]   ;;  %s3767_s11 = sld [smem:[#allocation13_spill]]  ;;  %vm556_vm1 = vcmask 261120  }
  0x5b   :  { %2699 = vmatprep.subr.bf16.mxu1 %v2900_v0  ;;  %v2903_v2 = vld [vmem:[%s3749_s1] sm:$0xff]   ;;  %v2902_v3 = vld [vmem:[#allocation2 + $0x10] sm:$0xff]   ;;  %v2905_v4 = vld [vmem:[%s3749_s1 + $0x8] sm:$0xff]  }
  0x5c   :  { %2700 = vmatpush3.bf16.msra.mxu1 %v2900_v0  ;;  %2679 = vmatprep.subr.bf16.mxu0 %v2903_v2  ;;  %v2907_v5 = vld [vmem:[%s3749_s1 + $0x10] sm:$0xff]   ;;  %v2904_v6 = vld [vmem:[#allocation2 + $0x18] sm:$0xff]   ;;  %v2906_v8 = vld [vmem:[#allocation2 + $0x20] sm:$0xff]   ;;  %v121_v0 = vlaneseq }
  0x5d   :  { %2701 = vmatprep.subr.bf16.mxu1 %v2901_v1  ;;  %2680 = vmatpush3.bf16.msra.mxu0 %v2903_v2  ;;  %v2909_v7 = vld [vmem:[%s3749_s1 + $0x18] sm:$0xff]   ;;  %v2911_v12 = vld [vmem:[%s3749_s1 + $0x20] sm:$0xff]   ;;  %v2908_v13 = vld [vmem:[#allocation2 + $0x28] sm:$0xff]  }
  0x5e   :  { %2681 = vmatprep.subr.bf16.mxu0 %v2905_v4  ;;  %v2913_v14 = vld [vmem:[%s3749_s1 + $0x28] sm:$0xff]   ;;  %v2910_v15 = vld [vmem:[#allocation2 + $0x30] sm:$0xff]   ;;  %v2912_v17 = vld [vmem:[#allocation2 + $0x38] sm:$0xff]  }
  0x5f   :  { %v2914_v16 = vld [vmem:[%s3749_s1 + $0x30] sm:$0xff]   ;;  %v2915_v20 = vld [vmem:[%s3749_s1 + $0x38] sm:$0xff]   ;;  %v2916_v22 = vld [vmem:[#allocation4] sm:$0xff]  }
  0x60   :  { %2702 = vmatpush3.bf16.msra.mxu1 %v2901_v1  ;;  %v3386_v9 = vld [vmem:[%s3767_s11] sm:$0xff]  ;;  %v3391_v10 = vld [vmem:[%s3767_s11 + $0x8] sm:$0xff]  ;;  %v3407_v18 = vld [vmem:[%s3767_s11 + $0x10] sm:$0xff]  ;;  %v3431_v1 = vshrl.u32 %v121_v0, 7 }
  0x61   :  { %2703 = vmatprep.subr.bf16.mxu1 %v2902_v3  ;;  %2682 = vmatpush3.bf16.msra.mxu0 %v2905_v4  ;;  %v137_v11 = vpack.c.bf16 %v3391_v10, %v3386_v9  ;;  %v3412_v19 = vld [vmem:[%s3767_s11 + $0x18] sm:$0xff]  ;;  %v2917_v23 = vld [vmem:[#allocation4 + $0x8] sm:$0xff]   ;;  %v2918_v24 = vld [vmem:[#allocation4 + $0x10] sm:$0xff]  }
  0x62   :  { %2683 = vmatprep.subr.bf16.mxu0 %v2907_v5  ;;  %v138_v21 = vpack.c.bf16 %v3412_v19, %v3407_v18  ;;  %v2919_v25 = vld [vmem:[#allocation4 + $0x18] sm:$0xff]   ;;  %v2920_v26 = vld [vmem:[#allocation4 + $0x20] sm:$0xff]   ;;  %v2921_v27 = vld [vmem:[#allocation4 + $0x28] sm:$0xff]   ;;  %v3434_v2 = vadd.s32 16, %v3431_v1 }
  0x63   :  { %2715 = vmatprep.mubr.bf16.mxu1 %v137_v11  ;;  %2695 = vmatprep.mubr.bf16.mxu0 %v137_v11  ;;  %v2922_v28 = vld [vmem:[#allocation4 + $0x30] sm:$0xff]   ;;  %v2923_v29 = vld [vmem:[#allocation4 + $0x38] sm:$0xff]   ;;  %v2333_v31 = vld [vmem:[%s3752_s4] ss:$0 sm:$0xff] }
  0x64   :  { %2704 = vmatpush3.bf16.msra.mxu1 %v2902_v3  ;;  %v2324_v33 = vld [vmem:[%s3750_s2] ss:$0 sm:$0xff]  ;;  %vm128_vm0 = vcmp.lt.s32.totalorder %v3434_v2, 20 }
  0x65   :  { %2705 = vmatprep.subr.bf16.mxu1 %v2904_v6  ;;  %2684 = vmatpush3.bf16.msra.mxu0 %v2907_v5  ;;  %v2342_v55 = vld [vmem:[%s3754_s6] ss:$0 sm:$0xff] }
  0x66   :  { %2685 = vmatprep.subr.bf16.mxu0 %v2909_v7  ;;  %v3428_v63 = vld [vmem:[#allocation6] sm:$0xff]  }
  0x68   :  { %2706 = vmatpush3.bf16.msra.mxu1 %v2904_v6 }
  0x69   :  { %2707 = vmatprep.subr.bf16.mxu1 %v2906_v8  ;;  %2686 = vmatpush3.bf16.msra.mxu0 %v2909_v7  ;;  %v3195_v7 = vmov -inf  }
  0x6a   :  { %2687 = vmatprep.subr.bf16.mxu0 %v2911_v12 }
  0x6c   :  { %2708 = vmatpush3.bf16.msra.mxu1 %v2906_v8  ;;  %v3441_v8 = vsel %vm556_vm1, -1e+30, %v3195_v7  ;;  %v2930_v7 = vld [vmem:[#allocation6 + $0x30] sm:$0xff]  }
  0x6d   :  { %2709 = vmatprep.subr.bf16.mxu1 %v2908_v13  ;;  %2688 = vmatpush3.bf16.msra.mxu0 %v2911_v12 }
  0x6e   :  { %2689 = vmatprep.subr.bf16.mxu0 %v2913_v14 }
  0x70   :  { %2710 = vmatpush3.bf16.msra.mxu1 %v2908_v13 }
  0x71   :  { %2711 = vmatprep.subr.bf16.mxu1 %v2910_v15  ;;  %2690 = vmatpush3.bf16.msra.mxu0 %v2913_v14 }
  0x72   :  { %2691 = vmatprep.subr.bf16.mxu0 %v2914_v16 }
  0x74   :  { %2712 = vmatpush3.bf16.msra.mxu1 %v2910_v15 }
  0x75   :  { %2713 = vmatprep.subr.bf16.mxu1 %v2912_v17  ;;  %2692 = vmatpush3.bf16.msra.mxu0 %v2914_v16 }
  0x76   :  { %2693 = vmatprep.subr.bf16.mxu0 %v2915_v20 }
  0x78   :  { %2714 = vmatpush3.bf16.msra.mxu1 %v2912_v17 }
  0x79   :  { %2694 = vmatpush3.bf16.msra.mxu0 %v2915_v20 }
  0x7a   :  { %2719 = vmatprep.subr.bf16.mxu0 %v2916_v22 }
  0x7b   :  { %2716 = vmatmul.mubr.bf16.vlgmr.msra.gmra.mrb[0].mxu1 %v138_v21 }
  0x7c   :  { %2696 = vmatmul.mubr.bf16.vlgmr.msra.gmra.mrb[0].mxu0 %v138_v21 }
  0x7d   :  { %2735 = vmatprep.mubr.bf16.mxu0 %v137_v11  ;;  %2720 = vmatpush3.bf16.msra.mxu0 %v2916_v22 }
  0x7e   :  { %2721 = vmatprep.subr.bf16.mxu0 %v2917_v23 }
  0x81   :  { %2722 = vmatpush3.bf16.msra.mxu0 %v2917_v23 }
  0x82   :  { %2723 = vmatprep.subr.bf16.mxu0 %v2918_v24 }
  0x85   :  { %2724 = vmatpush3.bf16.msra.mxu0 %v2918_v24 }
  0x86   :  { %2725 = vmatprep.subr.bf16.mxu0 %v2919_v25 }
  0x89   :  { %2726 = vmatpush3.bf16.msra.mxu0 %v2919_v25 }
  0x8a   :  { %2727 = vmatprep.subr.bf16.mxu0 %v2920_v26 }
  0x8d   :  { %2728 = vmatpush3.bf16.msra.mxu0 %v2920_v26 }
  0x8e   :  { %2729 = vmatprep.subr.bf16.mxu0 %v2921_v27 }
  0x91   :  { %2730 = vmatpush3.bf16.msra.mxu0 %v2921_v27 }
  0x92   :  { %2731 = vmatprep.subr.bf16.mxu0 %v2922_v28 }
  0x95   :  { %2732 = vmatpush3.bf16.msra.mxu0 %v2922_v28 }
  0x96   :  { %2733 = vmatprep.subr.bf16.mxu0 %v2923_v29 }
  0x99   :  { %2734 = vmatpush3.bf16.msra.mxu0 %v2923_v29 }
  0x9c   :  { %2736 = vmatmul.mubr.bf16.vlgmr.msra.gmra.mrb[4].mxu0 %v138_v21 }
 0x14e   :  { %v2717_v30 = vpop.f32.mrb[0].mxu1 }
 0x14f   :  { %v364_v32 = vpop.f32.mrb[1].mxu1  ;;  %v373_v35 = vadd.f32 %v2717_v30, %v2333_v31  ;;  %v2697_v38 = vpop.f32.mrb[0].mxu0 }
 0x150   :  { %v2718_v34 = vpop.f32.mrb[2].mxu1  ;;  %v365_v39 = vadd.f32 %v2333_v31, %v364_v32  ;;  %v253_v41 = vadd.f32 %v2697_v38, %v2324_v33  ;;  %v244_v42 = vpop.f32.mrb[1].mxu0 }
 0x151   :  { %v376_v36 = vadd.f32 %v2718_v34, %v2333_v31  ;;  %v367_v37 = vpop.f32.mrb[3].mxu1  ;;  %v245_v44 = vadd.f32 %v2324_v33, %v244_v42  ;;  %v2698_v45 = vpop.f32.mrb[2].mxu0 }
 0x152   :  { %v368_v40 = vadd.f32 %v2333_v31, %v367_v37  ;;  %v256_v47 = vadd.f32 %v2698_v45, %v2324_v33  ;;  %v247_v48 = vpop.f32.mrb[3].mxu0 }
 0x153   :  { %v502_v43 = vpack.c.bf16 %v376_v36, %v373_v35  ;;  %v248_v49 = vadd.f32 %v2324_v33, %v247_v48 }
 0x154   :  { %v501_v46 = vpack.c.bf16 %v368_v40, %v365_v39  ;;  %v500_v50 = vpack.c.bf16 %v256_v47, %v253_v41 }
 0x155   :  { %v499_v51 = vpack.c.bf16 %v248_v49, %v245_v44 }
 0x156   :  { %2739 = vmatprep.subr.bf16.mxu1 %v501_v46 }
 0x157   :  { %2740 = vmatpush3.bf16.xpose.msra.mxu1 %v501_v46  ;;  %2743 = vmatprep.mubr.bf16.mxu1 %v499_v51  ;;  %v3450_v51 = vand.u32 127, %v121_v0  ;;  %v2925_v0 = vld [vmem:[#allocation6 + $0x8] sm:$0xff]  }
 0x158   :  { %2741 = vmatprep.subr.bf16.mxu1 %v502_v43 }
 0x159   :  { %vm132_vm2 = vcmp.lt.s32.totalorder %v3450_v51, 20 }
 0x15f   :  { %2742 = vmatpush3.bf16.xpose.msra.mxu1 %v502_v43 }
 0x166   :  { %2744 = vmatmul.mubr.bf16.vlgmr.msra.gmra.mrb[4].mxu1 %v500_v50 }
 0x16f   :  { %v2737_v52 = vpop.f32.mrb[4].mxu0 }
 0x170   :  { %v484_v53 = vpop.f32.mrb[5].mxu0  ;;  %v493_v59 = vadd.f32 %v2737_v52, %v2342_v55 }
 0x171   :  { %v2738_v54 = vpop.f32.mrb[6].mxu0  ;;  %v485_v57 = vadd.f32 %v2342_v55, %v484_v53 }
 0x172   :  { %v487_v56 = vpop.f32.mrb[7].mxu0  ;;  %v496_v60 = vadd.f32 %v2738_v54, %v2342_v55 }
 0x173   :  { %v488_v58 = vadd.f32 %v2342_v55, %v487_v56 }
 0x174   :  { %v611_v62 = vpack.c.bf16 %v496_v60, %v493_v59 }
 0x175   :  { %v610_v61 = vpack.c.bf16 %v488_v58, %v485_v57 }
 0x177   :  { %2747 = vmatprep.subr.bf16.mxu1 %v610_v61 }
 0x178   :  { %2748 = vmatpush3.bf16.msra.mxu1 %v610_v61 }
 0x179   :  { %2749 = vmatprep.subr.bf16.mxu1 %v611_v62 }
 0x17c   :  { %2750 = vmatpush3.bf16.msra.mxu1 %v611_v62 }
 0x17d   :  { %2755 = vmatprep.subr.bf16.mxu1 %v3428_v63 }
 0x239   :  { %v2745_v3 = vpop.f32.mrb[4].mxu1 }
 0x23a   :  { %v554_v4 = vsel %vm128_vm0, %v2745_v3, -1e+30  ;;  %v537_v5 = vpop.f32.mrb[5].mxu1  ;;  %v2926_v3 = vld [vmem:[#allocation6 + $0x10] sm:$0xff]  }
 0x23b   :  { %v559_v6 = vsel %vm556_vm1, %v554_v4, -inf  ;;  %v2746_v11 = vpop.f32.mrb[6].mxu1  ;;  %v557_v13 = vsel %vm556_vm1, %v537_v5, -inf }
 0x23c   :  { %v540_v12 = vpop.f32.mrb[7].mxu1  ;;  %v562_v15 = vmax.f32 %v559_v6, %v3441_v8  ;;  %v2929_v6 = vld [vmem:[#allocation6 + $0x28] sm:$0xff]   ;;  %v2931_v11 = vld [vmem:[#allocation6 + $0x38] sm:$0xff]  }
 0x23d   :  { %v558_v14 = vsel %vm556_vm1, %v540_v12, -inf }
 0x23e   :  { %v561_v16 = vmax.f32 %v557_v13, %v558_v14  ;;  %v2937_v13 = vld [vmem:[%s3757_s9 + $0x14] ss:$8 sps:$4 sm:$0xff]   ;;  %v2935_v14 = vld [vmem:[%s3757_s9 + $0x10] ss:$8 sps:$4 sm:$0xff]  }
 0x240   :  { %v563_v17 = vmax.f32 %v561_v16, %v562_v15  ;;  %v2940_v15 = vld [vmem:[%s3757_s9 + $0x24] ss:$8 sps:$4 sm:$0xff]   ;;  %v2938_v16 = vld [vmem:[%s3757_s9 + $0x20] ss:$8 sps:$4 sm:$0xff]  }
 0x242   :  { %v564_v20 = vrot.slane %v563_v17, 4 }
 0x244   :  { %v565_v21 = vmax.f32 %v563_v17, %v564_v20  ;;  %v2943_v17 = vld [vmem:[%s3757_s9 + $0x34] ss:$8 sps:$4 sm:$0xff]   ;;  %v2941_v20 = vld [vmem:[%s3757_s9 + $0x30] ss:$8 sps:$4 sm:$0xff]  }
 0x246   :  { %v566_v22 = vrot.slane %v565_v21, 2 }
 0x248   :  { %v567_v23 = vmax.f32 %v565_v21, %v566_v22  ;;  %v2946_v21 = vld [vmem:[%s3757_s9 + $0x44] ss:$8 sps:$4 sm:$0xff]   ;;  %v2944_v22 = vld [vmem:[%s3757_s9 + $0x40] ss:$8 sps:$4 sm:$0xff]  }
 0x24a   :  { %v568_v24 = vrot.slane %v567_v23, 1 }
 0x24c   :  { %v569_v25 = vmax.f32 %v567_v23, %v568_v24  ;;  %v2949_v23 = vld [vmem:[%s3757_s9 + $0x54] ss:$8 sps:$4 sm:$0xff]   ;;  %v2947_v24 = vld [vmem:[%s3757_s9 + $0x50] ss:$8 sps:$4 sm:$0xff]  }
 0x24e   :  { %v570_v26 = vsub.f32 %v537_v5, %v569_v25  ;;  %v571_v27 = vsub.f32 %v540_v12, %v569_v25  ;;  %v572_v28 = vsub.f32 %v554_v4, %v569_v25  ;;  %v573_v29 = vsub.f32 -1e+30, %v569_v25  ;;  %v2927_v4 = vld [vmem:[#allocation6 + $0x18] sm:$0xff]   ;;  %v2928_v5 = vld [vmem:[#allocation6 + $0x20] sm:$0xff]  }
 0x24f   :  { %v2934_v12 = vld [vmem:[%s3757_s9 + $0x4] ss:$8 sps:$4 sm:$0xff]  }
 0x250   :  { %v574_v30 = vmul.f32 1.442695, %v570_v26  ;;  %v576_v31 = vmul.f32 1.442695, %v571_v27  ;;  %v578_v32 = vmul.f32 1.442695, %v572_v28  ;;  %903 = vmatprep.subr.bf16.mxu0 %v2934_v12 }
 0x251   :  { %v580_v33 = vmul.f32 1.442695, %v573_v29  ;;  %v819_v12 = vsub.s32 1, %v3431_v1 }
 0x252   :  { %3052 = vpow2.f32 %v574_v30 }
 0x253   :  { %3054 = vpow2.f32 %v576_v31  ;;  %v2952_v31 = vld [vmem:[%s3757_s9 + $0x64] ss:$8 sps:$4 sm:$0xff]  }
 0x254   :  { %3056 = vpow2.f32 %v578_v32  ;;  %v2950_v32 = vld [vmem:[%s3757_s9 + $0x60] ss:$8 sps:$4 sm:$0xff]  }
 0x255   :  { %3058 = vpow2.f32 %v580_v33  ;;  %v2955_v33 = vld [vmem:[%s3757_s9 + $0x74] ss:$8 sps:$4 sm:$0xff]  }
 0x25c   :  { %v3053_v34 = vpop.eup %3052 }
 0x25d   :  { %v3055_v35 = vpop.eup %3054  ;;  %v582_v36 = vsel %vm556_vm1, %v3053_v34, 0.0 }
 0x25e   :  { %v3057_v37 = vpop.eup %3056  ;;  %v583_v38 = vsel %vm556_vm1, %v3055_v35, 0.0 }
 0x25f   :  { %v3059_v39 = vpop.eup %3058  ;;  %v584_v40 = vadd.f32 %v583_v38, %v582_v36  ;;  %v585_v41 = vsel %vm556_vm1, %v3057_v37, 0.0  ;;  %v2956_v36 = vld [vmem:[#allocation7 + $0x40] sm:$0xff]   ;;  %v2958_v38 = vld [vmem:[#allocation7 + $0x48] sm:$0xff]  }
 0x260   :  { %v587_v43 = vsel %vm556_vm1, %v3059_v39, 0.0 }
 0x261   :  { %v586_v42 = vadd.f32 %v585_v41, %v584_v40  ;;  %v2960_v40 = vld [vmem:[#allocation7 + $0x50] sm:$0xff]  }
 0x262   :  { %v2961_v41 = vld [vmem:[#allocation7 + $0x10] sm:$0xff]  }
 0x263   :  { %v588_v44 = vadd.f32 %v587_v43, %v586_v42  ;;  %v2962_v42 = vld [vmem:[#allocation7 + $0x58] sm:$0xff]  }
 0x264   :  { %v2963_v43 = vld [vmem:[#allocation7 + $0x18] sm:$0xff]  }
 0x265   :  { %v589_v45 = vrot.slane %v588_v44, 4 }
 0x267   :  { %v590_v46 = vadd.f32 %v589_v45, %v588_v44  ;;  %v2964_v44 = vld [vmem:[#allocation7 + $0x60] sm:$0xff]  }
 0x268   :  { %v2965_v45 = vld [vmem:[#allocation7 + $0x20] sm:$0xff]  }
 0x269   :  { %v591_v47 = vrot.slane %v590_v46, 2 }
 0x26b   :  { %v592_v48 = vadd.f32 %v591_v47, %v590_v46  ;;  %v2966_v46 = vld [vmem:[#allocation7 + $0x68] sm:$0xff]   ;;  %v2353_v47 = vld [vmem:[%s3756_s8] ss:$0 sm:$0xff] }
 0x26d   :  { %v593_v49 = vrot.slane %v592_v48, 1 }
 0x26f   :  { %v594_v50 = vadd.f32 %v593_v49, %v592_v48 }
 0x271   :  { %3060 = vrcp.f32 %v594_v50 }
 0x27b   :  { %v3061_v52 = vpop.eup %3060 }
 0x27c   :  { %v596_v53 = vmul.f32 %v3061_v52, %v3053_v34  ;;  %v597_v54 = vmul.f32 %v3061_v52, %v3055_v35  ;;  %v598_v55 = vmul.f32 %v3061_v52, %v3057_v37  ;;  %v599_v56 = vmul.f32 %v3061_v52, %v3059_v39  ;;  %v2953_v34 = vld [vmem:[%s3757_s9 + $0x70] ss:$8 sps:$4 sm:$0xff]   ;;  %v2957_v37 = vld [vmem:[#allocation7] sm:$0xff]   ;;  %v2959_v39 = vld [vmem:[#allocation7 + $0x8] sm:$0xff]  }
 0x27d   :  { %v3196_v35 = vmov 0  }
 0x27e   :  { %v600_v57 = vsel %vm132_vm2, %v596_v53, 0.0  ;;  %v601_v58 = vsel %vm132_vm2, %v597_v54, 0.0  ;;  %v602_v59 = vsel %vm132_vm2, %v598_v55, 0.0  ;;  %v603_v60 = vsel %vm132_vm2, %v599_v56, 0.0  ;;  %935 = vmatprep.mubr.bf16.mxu0 %v3196_v35 }
 0x27f   :  { %604 = vst.msk [vmem:[%s3764_s16] sm:$0xff] %vm556_vm1, %v600_v57  ;;  %605 = vst.msk [vmem:[%s3764_s16 + $0x8] sm:$0xff] %vm556_vm1, %v601_v58  ;;  %v608_v61 = vpack.c.bf16 %v601_v58, %v600_v57  ;;  %v609_v62 = vpack.c.bf16 %v603_v60, %v602_v59 }
 0x280   :  { %606 = vst.msk [vmem:[%s3764_s16 + $0x10] sm:$0xff] %vm556_vm1, %v602_v59  ;;  %607 = vst.msk [vmem:[%s3764_s16 + $0x18] sm:$0xff] %vm556_vm1, %v603_v60 }
 0x281   :  { %2751 = vmatprep.mubr.msk.bf16.mxu1 %vm556_vm1, %v608_v61 }
 0x282   :  { %2752 = vmatmul.mubr.msk.bf16.vlgmr.msra.gmra.mrb[8].mxu1 %vm556_vm1, %v609_v62  ;;  %v2968_v62 = vld [vmem:[#allocation7 + $0x70] sm:$0xff]  }
 0x283   :  { %2756 = vmatpush3.bf16.msra.mxu1 %v3428_v63  ;;  %v2932_v63 = vld [vmem:[%s3757_s9] ss:$8 sps:$4 sm:$0xff]  }
 0x284   :  { %2757 = vmatprep.subr.bf16.mxu1 %v2925_v0  ;;  %904 = vmatpush1.bf16.msra.mxu0 %v2932_v63  ;;  %v811_v63 = vld [vmem:[%s3758_s10] sm:$0x3] }
 0x285   :  { %905 = vmatprep.subr.bf16.mxu0 %v2937_v13 }
 0x287   :  { %2758 = vmatpush3.bf16.msra.mxu1 %v2925_v0  ;;  %v2969_v0 = vld [vmem:[#allocation7 + $0x30] sm:$0xff]  }
 0x288   :  { %2759 = vmatprep.subr.bf16.mxu1 %v2926_v3  ;;  %906 = vmatpush1.bf16.msra.mxu0 %v2935_v14  ;;  %v820_v14 = vrot.slane %v811_v63, %v819_v12 }
 0x289   :  { %907 = vmatprep.subr.bf16.mxu0 %v2940_v15 }
 0x28b   :  { %2760 = vmatpush3.bf16.msra.mxu1 %v2926_v3  ;;  %v2970_v3 = vld [vmem:[#allocation7 + $0x78] sm:$0xff]  }
 0x28c   :  { %2761 = vmatprep.subr.bf16.mxu1 %v2927_v4  ;;  %908 = vmatpush1.bf16.msra.mxu0 %v2938_v16 }
 0x28d   :  { %909 = vmatprep.subr.bf16.mxu0 %v2943_v17 }
 0x28f   :  { %2762 = vmatpush3.bf16.msra.mxu1 %v2927_v4  ;;  %v2971_v4 = vld [vmem:[#allocation7 + $0x38] sm:$0xff]  }
 0x290   :  { %2763 = vmatprep.subr.bf16.mxu1 %v2928_v5  ;;  %910 = vmatpush1.bf16.msra.mxu0 %v2941_v20 }
 0x291   :  { %911 = vmatprep.subr.bf16.mxu0 %v2946_v21 }
 0x293   :  { %2764 = vmatpush3.bf16.msra.mxu1 %v2928_v5  ;;  %v2974_v5 = vld [vmem:[%s3749_s1 + $0x48] sm:$0xff]  }
 0x294   :  { %2765 = vmatprep.subr.bf16.mxu1 %v2929_v6  ;;  %912 = vmatpush1.bf16.msra.mxu0 %v2944_v22 }
 0x295   :  { %913 = vmatprep.subr.bf16.mxu0 %v2949_v23 }
 0x297   :  { %2766 = vmatpush3.bf16.msra.mxu1 %v2929_v6  ;;  %v2976_v6 = vld [vmem:[%s3749_s1 + $0x50] sm:$0xff]  }
 0x298   :  { %2767 = vmatprep.subr.bf16.mxu1 %v2930_v7  ;;  %914 = vmatpush1.bf16.msra.mxu0 %v2947_v24 }
 0x299   :  { %915 = vmatprep.subr.bf16.mxu0 %v2952_v31 }
 0x29b   :  { %2768 = vmatpush3.bf16.msra.mxu1 %v2930_v7  ;;  %v2978_v7 = vld [vmem:[%s3749_s1 + $0x58] sm:$0xff]  }
 0x29c   :  { %2769 = vmatprep.subr.bf16.mxu1 %v2931_v11  ;;  %916 = vmatpush1.bf16.msra.mxu0 %v2950_v32 }
 0x29d   :  { %917 = vmatprep.subr.bf16.mxu0 %v2955_v33 }
 0x29f   :  { %2770 = vmatpush3.bf16.msra.mxu1 %v2931_v11  ;;  %v815_v11 = vsub.s32 0, %v3431_v1 }
 0x2a0   :  { %918 = vmatpush1.bf16.msra.mxu0 %v2953_v34  ;;  %2565 = vmatprep.subr.bf16.mxu1 %v2956_v36  ;;  %v2975_v34 = vld [vmem:[#allocation2 + $0x48] sm:$0xff]  }
 0x2a1   :  { %v816_v13 = vrot.slane %v811_v63, %v815_v11 }
 0x355   :  { %v2753_v25 = vpop.f32.mrb[8].mxu1 }
 0x356   :  { %v652_v26 = vpop.f32.mrb[9].mxu1 }
 0x357   :  { %v2754_v27 = vpop.f32.mrb[10].mxu1 }
 0x358   :  { %v668_v28 = vpack.c.bf16 %v2754_v27, %v2753_v25  ;;  %v655_v29 = vpop.f32.mrb[11].mxu1 }
 0x359   :  { %v667_v30 = vpack.c.bf16 %v655_v29, %v652_v26 }
 0x35b   :  { %2771 = vmatprep.mubr.bf16.mxu1 %v667_v30 }
 0x35c   :  { %2772 = vmatmul.mubr.bf16.vlgmr.msra.gmra.mrb[12].mxu1 %v668_v28 }
 0x35d   :  { %2566 = vmatpush3.bf16.msra.mxu1 %v2957_v37 }
 0x35e   :  { %2567 = vmatprep.subr.bf16.mxu1 %v2958_v38 }
 0x361   :  { %2568 = vmatpush3.bf16.msra.mxu1 %v2959_v39 }
 0x362   :  { %2569 = vmatprep.subr.bf16.mxu1 %v2960_v40 }
 0x365   :  { %2570 = vmatpush3.bf16.msra.mxu1 %v2961_v41 }
 0x366   :  { %2571 = vmatprep.subr.bf16.mxu1 %v2962_v42 }
 0x369   :  { %2572 = vmatpush3.bf16.msra.mxu1 %v2963_v43  ;;  %v2977_v43 = vld [vmem:[#allocation2 + $0x50] sm:$0xff]  }
 0x36a   :  { %2573 = vmatprep.subr.bf16.mxu1 %v2964_v44 }
 0x36d   :  { %2574 = vmatpush3.bf16.msra.mxu1 %v2965_v45 }
 0x36e   :  { %2575 = vmatprep.subr.bf16.mxu1 %v2966_v46 }
 0x42f   :  { %v2773_v48 = vpop.f32.mrb[12].mxu1 }
 0x430   :  { %v774_v49 = vpop.f32.mrb[13].mxu1  ;;  %v783_v59 = vadd.f32 %v2773_v48, %v2353_v47  ;;  %v2979_v48 = vld [vmem:[#allocation2 + $0x58] sm:$0xff]  }
 0x431   :  { %v775_v50 = vadd.f32 %v2353_v47, %v774_v49  ;;  %v2774_v52 = vpop.f32.mrb[14].mxu1  ;;  %v2980_v49 = vld [vmem:[%s3749_s1 + $0x60] sm:$0xff]  }
 0x432   :  { %v777_v53 = vpop.f32.mrb[15].mxu1  ;;  %v786_v57 = vadd.f32 %v2774_v52, %v2353_v47  ;;  %v3545_v61 = vadd.f32 %v783_v59, %v3407_v18  ;;  %v2973_v18 = vld [vmem:[#allocation2 + $0x40] sm:$0xff]   ;;  %v2982_v52 = vld [vmem:[%s3749_s1 + $0x68] sm:$0xff]   ;;  %v2987_v59 = vld [vmem:[#allocation2 + $0x78] sm:$0xff]  }
 0x433   :  { %v778_v54 = vadd.f32 %v2353_v47, %v777_v53  ;;  %v3533_v55 = vadd.f32 %v775_v50, %v3386_v9  ;;  %v2981_v50 = vld [vmem:[#allocation2 + $0x60] sm:$0xff]   ;;  %v2983_v53 = vld [vmem:[#allocation2 + $0x68] sm:$0xff]  }
 0x434   :  { %v3542_v60 = vadd.f32 %v786_v57, %v3412_v19  ;;  %v2972_v19 = vld [vmem:[%s3749_s1 + $0x40] sm:$0xff]   ;;  %v2985_v57 = vld [vmem:[#allocation2 + $0x70] sm:$0xff]  }
 0x435   :  { %v3536_v56 = vadd.f32 %v778_v54, %v3391_v10  ;;  %v2967_v10 = vld [vmem:[#allocation7 + $0x28] sm:$0xff]   ;;  %2775 = vmatprep.subr.bf16.mxu0 %v2972_v19  ;;  %v2984_v54 = vld [vmem:[%s3749_s1 + $0x70] sm:$0xff]  }
 0x436   :  { %v794_v9 = vpack.c.bf16 %v3542_v60, %v3545_v61  ;;  %2576 = vmatpush3.bf16.msra.mxu1 %v2967_v10 }
 0x437   :  { %v793_v58 = vpack.c.bf16 %v3536_v56, %v3533_v55  ;;  %2577 = vmatprep.subr.bf16.mxu1 %v2968_v62  ;;  %v2378_v62 = vld [vmem:[%s3760_s12] ss:$0 sm:$0xff] }
 0x439   :  { %936 = vmatmul.mubr.bf16.vlgmr.msra.gmra.mrb[8].mxu0 %v793_v58  ;;  %v2986_v58 = vld [vmem:[%s3749_s1 + $0x78] sm:$0xff]  }
 0x43a   :  { %945 = vmatprep.mubr.bf16.mxu0 %v3196_v35  ;;  %2578 = vmatpush3.bf16.msra.mxu1 %v2969_v0 }
 0x43b   :  { %2579 = vmatprep.subr.bf16.mxu1 %v2970_v3  ;;  %2776 = vmatpush3.bf16.msra.mxu0 %v2972_v19 }
 0x43c   :  { %2777 = vmatprep.subr.bf16.mxu0 %v2974_v5 }
 0x43e   :  { %2580 = vmatpush3.bf16.msra.mxu1 %v2971_v4 }
 0x43f   :  { %2795 = vmatprep.subr.bf16.mxu1 %v2973_v18  ;;  %2778 = vmatpush3.bf16.msra.mxu0 %v2974_v5 }
 0x440   :  { %2779 = vmatprep.subr.bf16.mxu0 %v2976_v6 }
 0x441   :  { %946 = vmatmul.mubr.bf16.gmra.mrb[12].mxu0 %v794_v9  ;;  %v2988_v9 = vld [vmem:[#allocation4 + $0x40] sm:$0xff]  }
 0x443   :  { %2780 = vmatpush3.bf16.msra.mxu0 %v2976_v6 }
 0x444   :  { %2781 = vmatprep.subr.bf16.mxu0 %v2978_v7 }
 0x447   :  { %2782 = vmatpush3.bf16.msra.mxu0 %v2978_v7 }
 0x448   :  { %2783 = vmatprep.subr.bf16.mxu0 %v2980_v49 }
 0x44b   :  { %2784 = vmatpush3.bf16.msra.mxu0 %v2980_v49 }
 0x44c   :  { %2785 = vmatprep.subr.bf16.mxu0 %v2982_v52 }
 0x44f   :  { %2786 = vmatpush3.bf16.msra.mxu0 %v2982_v52 }
 0x450   :  { %2787 = vmatprep.subr.bf16.mxu0 %v2984_v54 }
 0x453   :  { %2788 = vmatpush3.bf16.msra.mxu0 %v2984_v54 }
 0x454   :  { %2789 = vmatprep.subr.bf16.mxu0 %v2986_v58 }
 0x457   :  { %2790 = vmatpush3.bf16.msra.mxu0 %v2986_v58 }
 0x458   :  { %2815 = vmatprep.subr.bf16.mxu0 %v2988_v9 }
 0x50c   :  { %v937_v15 = vpop.f32.mrb[8].mxu0 }
 0x50d   :  { %v938_v16 = vadd.f32 %v937_v15, %v816_v13  ;;  %v939_v17 = vpop.f32.mrb[9].mxu0 }
 0x50e   :  { %v940_v20 = vadd.f32 %v939_v17, %v820_v14  ;;  %v941_v21 = vpop.f32.mrb[10].mxu0 }
 0x50f   :  { %v942_v22 = vadd.f32 %v941_v21, %v816_v13  ;;  %v943_v23 = vpop.f32.mrb[11].mxu0  ;;  %v956_v25 = vmax.f32 %v938_v16, 0.0 }
 0x510   :  { %v944_v24 = vadd.f32 %v943_v23, %v820_v14  ;;  %v957_v27 = vmax.f32 %v940_v20, 0.0 }
 0x511   :  { %v958_v26 = vmax.f32 %v942_v22, 0.0 }
 0x512   :  { %v959_v28 = vmax.f32 %v944_v24, 0.0 }
 0x513   :  { %v964_v29 = vpack.c.bf16 %v958_v26, %v956_v25  ;;  %v2989_v25 = vld [vmem:[#allocation4 + $0x48] sm:$0xff]   ;;  %v2990_v26 = vld [vmem:[#allocation4 + $0x50] sm:$0xff]  }
 0x514   :  { %v965_v30 = vpack.c.bf16 %v959_v28, %v957_v27  ;;  %v947_v31 = vpop.f32.mrb[12].mxu0  ;;  %v2991_v27 = vld [vmem:[#allocation4 + $0x58] sm:$0xff]   ;;  %v2994_v28 = vld [vmem:[#allocation4 + $0x70] sm:$0xff]  }
 0x515   :  { %v948_v32 = vadd.f32 %v947_v31, %v816_v13  ;;  %v949_v33 = vpop.f32.mrb[13].mxu0  ;;  %v2412_v31 = vld [vmem:[%s3750_s2 + $0x1] ss:$0 sm:$0xff] }
 0x516   :  { %v950_v36 = vadd.f32 %v949_v33, %v820_v14  ;;  %v951_v37 = vpop.f32.mrb[14].mxu0  ;;  %1135 = vmatprep.mubr.bf16.mxu1 %v965_v30  ;;  %v2422_v33 = vld [vmem:[%s3752_s4 + $0x1] ss:$0 sm:$0xff] }
 0x517   :  { %v952_v38 = vadd.f32 %v951_v37, %v816_v13  ;;  %v953_v39 = vpop.f32.mrb[15].mxu0  ;;  %1136 = vmatmul.mubr.bf16.vlgmr.msra.gmra.mrb[16].mxu1 %v964_v29  ;;  %v960_v41 = vmax.f32 %v948_v32, 0.0  ;;  %v2995_v29 = vld [vmem:[#allocation4 + $0x78] sm:$0xff]  }
 0x518   :  { %v954_v40 = vadd.f32 %v953_v39, %v820_v14  ;;  %2796 = vmatpush3.bf16.msra.mxu1 %v2973_v18  ;;  %v961_v44 = vmax.f32 %v950_v36, 0.0 }
 0x519   :  { %v962_v42 = vmax.f32 %v952_v38, 0.0  ;;  %2797 = vmatprep.subr.bf16.mxu1 %v2975_v34 }
 0x51a   :  { %v963_v45 = vmax.f32 %v954_v40, 0.0 }
 0x51b   :  { %v966_v46 = vpack.c.bf16 %v962_v42, %v960_v41 }
 0x51c   :  { %v967_v47 = vpack.c.bf16 %v963_v45, %v961_v44  ;;  %2798 = vmatpush3.bf16.msra.mxu1 %v2975_v34 }
 0x51d   :  { %2799 = vmatprep.subr.bf16.mxu1 %v2977_v43 }
 0x51e   :  { %1143 = vmatprep.mubr.bf16.mxu1 %v967_v47 }
 0x51f   :  { %1144 = vmatmul.mubr.bf16.gmra.mrb[20].mxu1 %v966_v46 }
 0x520   :  { %2800 = vmatpush3.bf16.msra.mxu1 %v2977_v43 }
 0x521   :  { %2801 = vmatprep.subr.bf16.mxu1 %v2979_v48 }
 0x524   :  { %2802 = vmatpush3.bf16.msra.mxu1 %v2979_v48 }
 0x525   :  { %2803 = vmatprep.subr.bf16.mxu1 %v2981_v50 }
 0x528   :  { %2804 = vmatpush3.bf16.msra.mxu1 %v2981_v50 }
 0x529   :  { %2805 = vmatprep.subr.bf16.mxu1 %v2983_v53 }
 0x52c   :  { %2806 = vmatpush3.bf16.msra.mxu1 %v2983_v53 }
 0x52d   :  { %2807 = vmatprep.subr.bf16.mxu1 %v2985_v57 }
 0x530   :  { %2808 = vmatpush3.bf16.msra.mxu1 %v2985_v57  ;;  %v2432_v57 = vld [vmem:[%s3754_s6 + $0x1] ss:$0 sm:$0xff] }
 0x531   :  { %2809 = vmatprep.subr.bf16.mxu1 %v2987_v59 }
 0x534   :  { %2810 = vmatpush3.bf16.msra.mxu1 %v2987_v59 }
 0x5ea   :  { %v2581_v10 = vpop.f32.mrb[16].mxu1 }
 0x5eb   :  { %v2582_v0 = vpop.f32.mrb[17].mxu1 }
 0x5ec   :  { %v2583_v3 = vadd.f32 %v2582_v0, %v2581_v10  ;;  %v2584_v4 = vpop.f32.mrb[18].mxu1 }
 0x5ed   :  { %v2585_v19 = vpop.f32.mrb[19].mxu1 }
 0x5ee   :  { %v1138_v18 = vadd.f32 %v2583_v3, %v2378_v62  ;;  %v2586_v5 = vadd.f32 %v2585_v19, %v2584_v4 }
 0x5f0   :  { %v1141_v6 = vadd.f32 %v2586_v5, %v2378_v62  ;;  %v3586_v7 = vadd.f32 %v1138_v18, %v3533_v55  ;;  %v3611_v18 = vld [vmem:[#allocation6 + $0x40] sm:$0xff]  }
 0x5f2   :  { %v3589_v63 = vadd.f32 %v1141_v6, %v3536_v56  ;;  %v2587_v13 = vpop.f32.mrb[20].mxu1 }
 0x5f3   :  { %v2588_v14 = vpop.f32.mrb[21].mxu1 }
 0x5f4   :  { %v2589_v15 = vadd.f32 %v2588_v14, %v2587_v13  ;;  %v2590_v16 = vpop.f32.mrb[22].mxu1  ;;  %v1156_v17 = vpack.c.bf16 %v3589_v63, %v3586_v7 }
 0x5f5   :  { %v2591_v20 = vpop.f32.mrb[23].mxu1 }
 0x5f6   :  { %v1146_v21 = vadd.f32 %v2589_v15, %v2378_v62  ;;  %v2592_v22 = vadd.f32 %v2591_v20, %v2590_v16  ;;  %2791 = vmatprep.mubr.bf16.mxu0 %v1156_v17  ;;  %2811 = vmatprep.mubr.bf16.mxu1 %v1156_v17 }
 0x5f8   :  { %v1149_v23 = vadd.f32 %v2592_v22, %v2378_v62  ;;  %v3594_v24 = vadd.f32 %v1146_v21, %v3545_v61  ;;  %v2992_v61 = vld [vmem:[#allocation4 + $0x60] sm:$0xff]  }
 0x5fa   :  { %v3597_v55 = vadd.f32 %v1149_v23, %v3542_v60  ;;  %v2993_v60 = vld [vmem:[#allocation4 + $0x68] sm:$0xff]  }
 0x5fc   :  { %v1157_v56 = vpack.c.bf16 %v3597_v55, %v3594_v24 }
 0x5fe   :  { %2792 = vmatmul.mubr.bf16.vlgmr.msra.gmra.mrb[16].mxu0 %v1157_v56  ;;  %2812 = vmatmul.mubr.bf16.vlgmr.msra.gmra.mrb[24].mxu1 %v1157_v56 }
 0x5ff   :  { %2816 = vmatpush3.bf16.msra.mxu0 %v2988_v9  ;;  %2831 = vmatprep.mubr.bf16.mxu0 %v1156_v17 }
 0x600   :  { %2817 = vmatprep.subr.bf16.mxu0 %v2989_v25 }
 0x603   :  { %2818 = vmatpush3.bf16.msra.mxu0 %v2989_v25 }
 0x604   :  { %2819 = vmatprep.subr.bf16.mxu0 %v2990_v26 }
 0x607   :  { %2820 = vmatpush3.bf16.msra.mxu0 %v2990_v26 }
 0x608   :  { %2821 = vmatprep.subr.bf16.mxu0 %v2991_v27 }
 0x60b   :  { %2822 = vmatpush3.bf16.msra.mxu0 %v2991_v27 }
 0x60c   :  { %2823 = vmatprep.subr.bf16.mxu0 %v2992_v61 }
 0x60f   :  { %2824 = vmatpush3.bf16.msra.mxu0 %v2992_v61 }
 0x610   :  { %2825 = vmatprep.subr.bf16.mxu0 %v2993_v60 }
 0x613   :  { %2826 = vmatpush3.bf16.msra.mxu0 %v2993_v60 }
 0x614   :  { %2827 = vmatprep.subr.bf16.mxu0 %v2994_v28 }
 0x617   :  { %2828 = vmatpush3.bf16.msra.mxu0 %v2994_v28 }
 0x618   :  { %2829 = vmatprep.subr.bf16.mxu0 %v2995_v29 }
 0x61b   :  { %2830 = vmatpush3.bf16.msra.mxu0 %v2995_v29 }
 0x61e   :  { %2832 = vmatmul.mubr.bf16.vlgmr.msra.gmra.mrb[20].mxu0 %v1157_v56 }
 0x6d1   :  { %v2793_v30 = vpop.f32.mrb[16].mxu0  ;;  %v2813_v32 = vpop.f32.mrb[24].mxu1 }
 0x6d2   :  { %v1265_v34 = vpop.f32.mrb[17].mxu0  ;;  %v1387_v36 = vpop.f32.mrb[25].mxu1  ;;  %v1274_v39 = vadd.f32 %v2793_v30, %v2412_v31  ;;  %v1396_v40 = vadd.f32 %v2813_v32, %v2422_v33 }
 0x6d3   :  { %v2794_v37 = vpop.f32.mrb[18].mxu0  ;;  %v2814_v38 = vpop.f32.mrb[26].mxu1  ;;  %v1266_v45 = vadd.f32 %v2412_v31, %v1265_v34  ;;  %v1388_v46 = vadd.f32 %v2422_v33, %v1387_v36 }
 0x6d4   :  { %v1277_v41 = vadd.f32 %v2794_v37, %v2412_v31  ;;  %v1399_v42 = vadd.f32 %v2814_v38, %v2422_v33  ;;  %v1268_v43 = vpop.f32.mrb[19].mxu0  ;;  %v1390_v44 = vpop.f32.mrb[27].mxu1 }
 0x6d5   :  { %v1269_v47 = vadd.f32 %v2412_v31, %v1268_v43  ;;  %v1391_v48 = vadd.f32 %v2422_v33, %v1390_v44 }
 0x6d6   :  { %v1525_v49 = vpack.c.bf16 %v1277_v41, %v1274_v39  ;;  %v1527_v50 = vpack.c.bf16 %v1399_v42, %v1396_v40 }
 0x6d7   :  { %v1524_v52 = vpack.c.bf16 %v1269_v47, %v1266_v45  ;;  %v1526_v53 = vpack.c.bf16 %v1391_v48, %v1388_v46 }
 0x6d9   :  { %2835 = vmatprep.subr.bf16.mxu1 %v1526_v53  ;;  %2839 = vmatprep.mubr.bf16.mxu1 %v1524_v52 }
 0x6da   :  { %2836 = vmatpush3.bf16.xpose.msra.mxu1 %v1526_v53 }
 0x6db   :  { %2837 = vmatprep.subr.bf16.mxu1 %v1527_v50 }
 0x6e2   :  { %2838 = vmatpush3.bf16.xpose.msra.mxu1 %v1527_v50 }
 0x6e9   :  { %2840 = vmatmul.mubr.bf16.vlgmr.msra.gmra.mrb[28].mxu1 %v1525_v49 }
 0x6ea   :  { %1964 = vmatprep.mubr.bf16.mxu1 %v3196_v35 }
 0x6f1   :  { %v2833_v54 = vpop.f32.mrb[20].mxu0 }
 0x6f2   :  { %v1509_v58 = vpop.f32.mrb[21].mxu0  ;;  %v1518_v9 = vadd.f32 %v2833_v54, %v2432_v57 }
 0x6f3   :  { %v2834_v59 = vpop.f32.mrb[22].mxu0  ;;  %v1510_v0 = vadd.f32 %v2432_v57, %v1509_v58 }
 0x6f4   :  { %v1521_v10 = vadd.f32 %v2834_v59, %v2432_v57  ;;  %v1512_v62 = vpop.f32.mrb[23].mxu0 }
 0x6f5   :  { %v1513_v3 = vadd.f32 %v2432_v57, %v1512_v62 }
 0x6f6   :  { %v1636_v4 = vpack.c.bf16 %v1521_v10, %v1518_v9 }
 0x6f7   :  { %v1635_v19 = vpack.c.bf16 %v1513_v3, %v1510_v0 }
 0x6f9   :  { %2843 = vmatprep.subr.bf16.mxu0 %v1635_v19 }
 0x6fa   :  { %2844 = vmatpush3.bf16.msra.mxu0 %v1635_v19  ;;  %v2998_v19 = vld [vmem:[#allocation6 + $0x50] sm:$0xff]  }
 0x6fb   :  { %2845 = vmatprep.subr.bf16.mxu0 %v1636_v4 }
 0x6fe   :  { %2846 = vmatpush3.bf16.msra.mxu0 %v1636_v4  ;;  %v2997_v4 = vld [vmem:[#allocation6 + $0x48] sm:$0xff]  }
 0x6ff   :  { %2851 = vmatprep.subr.bf16.mxu0 %v3611_v18 }
 0x7bc   :  { %v2841_v5 = vpop.f32.mrb[28].mxu1 }
 0x7bd   :  { %v1579_v6 = vsel %vm128_vm0, %v2841_v5, -1e+30  ;;  %v1562_v13 = vpop.f32.mrb[29].mxu1  ;;  %v2999_v5 = vld [vmem:[#allocation6 + $0x58] sm:$0xff]  }
 0x7be   :  { %v1583_v14 = vsel %vm556_vm1, %v1579_v6, -inf  ;;  %v2842_v15 = vpop.f32.mrb[30].mxu1  ;;  %v1581_v17 = vsel %vm556_vm1, %v1562_v13, -inf }
 0x7bf   :  { %v1565_v16 = vpop.f32.mrb[31].mxu1  ;;  %v1586_v21 = vmax.f32 %v1583_v14, %v3441_v8  ;;  %v3002_v14 = vld [vmem:[#allocation6 + $0x70] sm:$0xff]   ;;  %v3003_v15 = vld [vmem:[#allocation6 + $0x78] sm:$0xff]  }
 0x7c0   :  { %v1582_v20 = vsel %vm556_vm1, %v1565_v16, -inf }
 0x7c1   :  { %v1585_v22 = vmax.f32 %v1581_v17, %v1582_v20  ;;  %v3009_v17 = vld [vmem:[%s3757_s9 + $0x94] ss:$8 sps:$4 sm:$0xff]   ;;  %v3007_v20 = vld [vmem:[%s3757_s9 + $0x90] ss:$8 sps:$4 sm:$0xff]  }
 0x7c3   :  { %v1587_v23 = vmax.f32 %v1585_v22, %v1586_v21  ;;  %v3012_v21 = vld [vmem:[%s3757_s9 + $0xa4] ss:$8 sps:$4 sm:$0xff]   ;;  %v3010_v22 = vld [vmem:[%s3757_s9 + $0xa0] ss:$8 sps:$4 sm:$0xff]  }
 0x7c5   :  { %v1588_v56 = vrot.slane %v1587_v23, 4 }
 0x7c7   :  { %v1589_v25 = vmax.f32 %v1587_v23, %v1588_v56  ;;  %v3015_v23 = vld [vmem:[%s3757_s9 + $0xb4] ss:$8 sps:$4 sm:$0xff]   ;;  %v3013_v56 = vld [vmem:[%s3757_s9 + $0xb0] ss:$8 sps:$4 sm:$0xff]  }
 0x7c9   :  { %v1590_v26 = vrot.slane %v1589_v25, 2 }
 0x7cb   :  { %v1591_v27 = vmax.f32 %v1589_v25, %v1590_v26  ;;  %v3018_v25 = vld [vmem:[%s3757_s9 + $0xc4] ss:$8 sps:$4 sm:$0xff]   ;;  %v3016_v26 = vld [vmem:[%s3757_s9 + $0xc0] ss:$8 sps:$4 sm:$0xff]  }
 0x7cd   :  { %v1592_v61 = vrot.slane %v1591_v27, 1 }
 0x7cf   :  { %v1593_v2 = vmax.f32 %v1591_v27, %v1592_v61  ;;  %v3021_v27 = vld [vmem:[%s3757_s9 + $0xd4] ss:$8 sps:$4 sm:$0xff]   ;;  %v3019_v61 = vld [vmem:[%s3757_s9 + $0xd0] ss:$8 sps:$4 sm:$0xff]  }
 0x7d1   :  { %v1594_v60 = vsub.f32 %v1562_v13, %v1593_v2  ;;  %v1595_v28 = vsub.f32 %v1565_v16, %v1593_v2  ;;  %v1596_v29 = vsub.f32 %v1579_v6, %v1593_v2  ;;  %v1597_v30 = vsub.f32 -1e+30, %v1593_v2  ;;  %v3000_v6 = vld [vmem:[#allocation6 + $0x60] sm:$0xff]   ;;  %v3001_v13 = vld [vmem:[#allocation6 + $0x68] sm:$0xff]  }
 0x7d2   :  { %v3006_v16 = vld [vmem:[%s3757_s9 + $0x84] ss:$8 sps:$4 sm:$0xff]  }
 0x7d3   :  { %v1598_v31 = vmul.f32 1.442695, %v1594_v60  ;;  %v1600_v32 = vmul.f32 1.442695, %v1595_v28  ;;  %v1602_v33 = vmul.f32 1.442695, %v1596_v29  ;;  %1932 = vmatprep.subr.bf16.mxu1 %v3006_v16 }
 0x7d4   :  { %v1604_v34 = vmul.f32 1.442695, %v1597_v30 }
 0x7d5   :  { %3062 = vpow2.f32 %v1598_v31 }
 0x7d6   :  { %3064 = vpow2.f32 %v1600_v32  ;;  %v3024_v32 = vld [vmem:[%s3757_s9 + $0xe4] ss:$8 sps:$4 sm:$0xff]  }
 0x7d7   :  { %3066 = vpow2.f32 %v1602_v33  ;;  %v3022_v33 = vld [vmem:[%s3757_s9 + $0xe0] ss:$8 sps:$4 sm:$0xff]  }
 0x7d8   :  { %3068 = vpow2.f32 %v1604_v34  ;;  %v3027_v34 = vld [vmem:[%s3757_s9 + $0xf4] ss:$8 sps:$4 sm:$0xff]  }
 0x7df   :  { %v3063_v8 = vpop.eup %3062 }
 0x7e0   :  { %v3065_v36 = vpop.eup %3064  ;;  %v1606_v37 = vsel %vm556_vm1, %v3063_v8, 0.0 }
 0x7e1   :  { %v3067_v38 = vpop.eup %3066  ;;  %v1607_v39 = vsel %vm556_vm1, %v3065_v36, 0.0 }
 0x7e2   :  { %v3069_v40 = vpop.eup %3068  ;;  %v1608_v41 = vadd.f32 %v1607_v39, %v1606_v37  ;;  %v1609_v42 = vsel %vm556_vm1, %v3067_v38, 0.0  ;;  %v3029_v37 = vld [vmem:[#allocation7 + $0x80] sm:$0xff]   ;;  %v3031_v39 = vld [vmem:[#allocation7 + $0x88] sm:$0xff]  }
 0x7e3   :  { %v1611_v44 = vsel %vm556_vm1, %v3069_v40, 0.0 }
 0x7e4   :  { %v1610_v43 = vadd.f32 %v1609_v42, %v1608_v41  ;;  %v3033_v41 = vld [vmem:[#allocation7 + $0x90] sm:$0xff]   ;;  %v3034_v42 = vld [vmem:[#allocation7 + $0xd8] sm:$0xff]  }
 0x7e6   :  { %v1612_v45 = vadd.f32 %v1611_v44, %v1610_v43  ;;  %v3035_v43 = vld [vmem:[#allocation7 + $0x98] sm:$0xff]   ;;  %v3036_v44 = vld [vmem:[#allocation7 + $0xe0] sm:$0xff]  }
 0x7e8   :  { %v1613_v46 = vrot.slane %v1612_v45, 4 }
 0x7ea   :  { %v1614_v47 = vadd.f32 %v1613_v46, %v1612_v45  ;;  %v3037_v45 = vld [vmem:[#allocation7 + $0xa0] sm:$0xff]   ;;  %v3038_v46 = vld [vmem:[#allocation7 + $0xe8] sm:$0xff]  }
 0x7ec   :  { %v1615_v48 = vrot.slane %v1614_v47, 2 }
 0x7ee   :  { %v1616_v49 = vadd.f32 %v1615_v48, %v1614_v47  ;;  %v2448_v47 = vld [vmem:[%s3756_s8 + $0x1] ss:$0 sm:$0xff] }
 0x7f0   :  { %v1617_v50 = vrot.slane %v1616_v49, 1 }
 0x7f2   :  { %v1618_v52 = vadd.f32 %v1617_v50, %v1616_v49 }
 0x7f4   :  { %3070 = vrcp.f32 %v1618_v52 }
 0x7fe   :  { %v3071_v53 = vpop.eup %3070 }
 0x7ff   :  { %v1620_v54 = vmul.f32 %v3071_v53, %v3063_v8  ;;  %v1621_v57 = vmul.f32 %v3071_v53, %v3065_v36  ;;  %v1622_v58 = vmul.f32 %v3071_v53, %v3067_v38  ;;  %v1623_v59 = vmul.f32 %v3071_v53, %v3069_v40  ;;  %v3025_v8 = vld [vmem:[%s3757_s9 + $0xf0] ss:$8 sps:$4 sm:$0xff]   ;;  %v3028_v36 = vld [vmem:[#allocation7 + $0xc0] sm:$0xff]   ;;  %v3030_v38 = vld [vmem:[#allocation7 + $0xc8] sm:$0xff]  }
 0x800   :  { %v3032_v40 = vld [vmem:[#allocation7 + $0xd0] sm:$0xff]  }
 0x801   :  { %v1624_v9 = vsel %vm132_vm2, %v1620_v54, 0.0  ;;  %v1625_v10 = vsel %vm132_vm2, %v1621_v57, 0.0  ;;  %v1626_v62 = vsel %vm132_vm2, %v1622_v58, 0.0  ;;  %v1627_v0 = vsel %vm132_vm2, %v1623_v59, 0.0 }
 0x802   :  { %2441 = vst.msk [vmem:[%s3764_s16 + $0x20] sm:$0xff] %vm556_vm1, %v1624_v9  ;;  %2442 = vst.msk [vmem:[%s3764_s16 + $0x28] sm:$0xff] %vm556_vm1, %v1625_v10  ;;  %v1633_v3 = vpack.c.bf16 %v1625_v10, %v1624_v9  ;;  %v1634_v51 = vpack.c.bf16 %v1627_v0, %v1626_v62 }
 0x803   :  { %2443 = vst.msk [vmem:[%s3764_s16 + $0x30] sm:$0xff] %vm556_vm1, %v1626_v62  ;;  %2444 = vst.msk [vmem:[%s3764_s16 + $0x38] sm:$0xff] %vm556_vm1, %v1627_v0 }
 0x804   :  { %2847 = vmatprep.mubr.msk.bf16.mxu0 %vm556_vm1, %v1633_v3  ;;  %v3040_v3 = vld [vmem:[#allocation7 + $0xf0] sm:$0xff]  }
 0x805   :  { %2848 = vmatmul.mubr.msk.bf16.vlgmr.msra.gmra.mrb[24].mxu0 %vm556_vm1, %v1634_v51  ;;  %v3041_v51 = vld [vmem:[#allocation7 + $0xb0] sm:$0xff]  }
 0x806   :  { %2852 = vmatpush3.bf16.msra.mxu0 %v3611_v18  ;;  %v3004_v18 = vld [vmem:[%s3757_s9 + $0x80] ss:$8 sps:$4 sm:$0xff]  }
 0x807   :  { %2853 = vmatprep.subr.bf16.mxu0 %v2997_v4  ;;  %1933 = vmatpush1.bf16.msra.mxu1 %v3004_v18 }
 0x808   :  { %1934 = vmatprep.subr.bf16.mxu1 %v3009_v17 }
 0x80a   :  { %2854 = vmatpush3.bf16.msra.mxu0 %v2997_v4  ;;  %v3042_v4 = vld [vmem:[#allocation7 + $0xf8] sm:$0xff]  }
 0x80b   :  { %2855 = vmatprep.subr.bf16.mxu0 %v2998_v19  ;;  %1935 = vmatpush1.bf16.msra.mxu1 %v3007_v20 }
 0x80c   :  { %1936 = vmatprep.subr.bf16.mxu1 %v3012_v21 }
 0x80e   :  { %2856 = vmatpush3.bf16.msra.mxu0 %v2998_v19  ;;  %v3043_v19 = vld [vmem:[#allocation7 + $0xb8] sm:$0xff]  }
 0x80f   :  { %2857 = vmatprep.subr.bf16.mxu0 %v2999_v5  ;;  %1937 = vmatpush1.bf16.msra.mxu1 %v3010_v22 }
 0x810   :  { %1938 = vmatprep.subr.bf16.mxu1 %v3015_v23 }
 0x812   :  { %2858 = vmatpush3.bf16.msra.mxu0 %v2999_v5  ;;  %v2473_v5 = vld [vmem:[%s3758_s10 + $0x2] sm:$0x3] }
 0x813   :  { %2859 = vmatprep.subr.bf16.mxu0 %v3000_v6  ;;  %1939 = vmatpush1.bf16.msra.mxu1 %v3013_v56 }
 0x814   :  { %1940 = vmatprep.subr.bf16.mxu1 %v3018_v25 }
 0x816   :  { %2860 = vmatpush3.bf16.msra.mxu0 %v3000_v6  ;;  %v1845_v6 = vrot.slane %v2473_v5, %v815_v11 }
 0x817   :  { %2861 = vmatprep.subr.bf16.mxu0 %v3001_v13  ;;  %1941 = vmatpush1.bf16.msra.mxu1 %v3016_v26 }
 0x818   :  { %1942 = vmatprep.subr.bf16.mxu1 %v3021_v27 }
 0x81a   :  { %2862 = vmatpush3.bf16.msra.mxu0 %v3001_v13  ;;  %v1849_v13 = vrot.slane %v2473_v5, %v819_v12 }
 0x81b   :  { %2863 = vmatprep.subr.bf16.mxu0 %v3002_v14  ;;  %1943 = vmatpush1.bf16.msra.mxu1 %v3019_v61 }
 0x81c   :  { %1944 = vmatprep.subr.bf16.mxu1 %v3024_v32 }
 0x81e   :  { %2864 = vmatpush3.bf16.msra.mxu0 %v3002_v14 }
 0x81f   :  { %2865 = vmatprep.subr.bf16.mxu0 %v3003_v15  ;;  %1945 = vmatpush1.bf16.msra.mxu1 %v3022_v33 }
 0x820   :  { %1946 = vmatprep.subr.bf16.mxu1 %v3027_v34 }
 0x822   :  { %2866 = vmatpush3.bf16.msra.mxu0 %v3003_v15 }
 0x823   :  { %1947 = vmatpush1.bf16.msra.mxu1 %v3025_v8  ;;  %2641 = vmatprep.subr.bf16.mxu0 %v3028_v36 }
 0x8d8   :  { %v2849_v2 = vpop.f32.mrb[24].mxu0 }
 0x8d9   :  { %v1677_v60 = vpop.f32.mrb[25].mxu0 }
 0x8da   :  { %v2850_v28 = vpop.f32.mrb[26].mxu0 }
 0x8db   :  { %v1693_v29 = vpack.c.bf16 %v2850_v28, %v2849_v2  ;;  %v1680_v30 = vpop.f32.mrb[27].mxu0 }
 0x8dc   :  { %v1692_v31 = vpack.c.bf16 %v1680_v30, %v1677_v60 }
 0x8de   :  { %2867 = vmatprep.mubr.bf16.mxu0 %v1692_v31 }
 0x8df   :  { %2868 = vmatmul.mubr.bf16.vlgmr.msra.gmra.mrb[28].mxu0 %v1693_v29 }
 0x8e0   :  { %2642 = vmatpush3.bf16.msra.mxu0 %v3029_v37  ;;  %v3047_v37 = vld [vmem:[#allocation9 + $0x18] sm:$0xff]  }
 0x8e1   :  { %2643 = vmatprep.subr.bf16.mxu0 %v3030_v38  ;;  %v3048_v38 = vld [vmem:[#allocation9 + $0x20] sm:$0xff]  }
 0x8e4   :  { %2644 = vmatpush3.bf16.msra.mxu0 %v3031_v39  ;;  %v3049_v39 = vld [vmem:[#allocation9 + $0x28] sm:$0xff]  }
 0x8e5   :  { %2645 = vmatprep.subr.bf16.mxu0 %v3032_v40  ;;  %v3050_v40 = vld [vmem:[#allocation9 + $0x30] sm:$0xff]  }
 0x8e8   :  { %2646 = vmatpush3.bf16.msra.mxu0 %v3033_v41  ;;  %v3051_v41 = vld [vmem:[#allocation9 + $0x38] sm:$0xff]  }
 0x8e9   :  { %2647 = vmatprep.subr.bf16.mxu0 %v3034_v42 }
 0x8ec   :  { %2648 = vmatpush3.bf16.msra.mxu0 %v3035_v43  ;;  %v2491_v43 = vld [vmem:[%s3760_s12 + $0x1] ss:$0 sm:$0xff] }
 0x8ed   :  { %2649 = vmatprep.subr.bf16.mxu0 %v3036_v44 }
 0x8f0   :  { %2650 = vmatpush3.bf16.msra.mxu0 %v3037_v45 }
 0x8f1   :  { %2651 = vmatprep.subr.bf16.mxu0 %v3038_v46 }
 0x9b2   :  { %v2869_v48 = vpop.f32.mrb[28].mxu0 }
 0x9b3   :  { %v1801_v49 = vpop.f32.mrb[29].mxu0  ;;  %v1810_v10 = vadd.f32 %v2869_v48, %v2448_v47 }
 0x9b4   :  { %v1802_v50 = vadd.f32 %v2448_v47, %v1801_v49  ;;  %v2870_v52 = vpop.f32.mrb[30].mxu0 }
 0x9b5   :  { %v1804_v53 = vpop.f32.mrb[31].mxu0  ;;  %v1813_v59 = vadd.f32 %v2870_v52, %v2448_v47  ;;  %v3715_v0 = vadd.f32 %v1810_v10, %v3594_v24  ;;  %v3046_v24 = vld [vmem:[#allocation9 + $0x10] sm:$0xff]  }
 0x9b6   :  { %v1805_v54 = vadd.f32 %v2448_v47, %v1804_v53  ;;  %v3703_v57 = vadd.f32 %v1802_v50, %v3586_v7 }
 0x9b7   :  { %v3712_v62 = vadd.f32 %v1813_v59, %v3597_v55  ;;  %v3045_v55 = vld [vmem:[#allocation9 + $0x8] sm:$0xff]  }
 0x9b8   :  { %v3706_v58 = vadd.f32 %v1805_v54, %v3589_v63  ;;  %v3039_v63 = vld [vmem:[#allocation7 + $0xa8] sm:$0xff]  }
 0x9b9   :  { %v1821_v7 = vpack.c.bf16 %v3712_v62, %v3715_v0  ;;  %2652 = vmatpush3.bf16.msra.mxu0 %v3039_v63 }
 0x9ba   :  { %v1820_v9 = vpack.c.bf16 %v3706_v58, %v3703_v57  ;;  %2653 = vmatprep.subr.bf16.mxu0 %v3040_v3 }
 0x9bc   :  { %1965 = vmatmul.mubr.bf16.vlgmr.msra.gmra.mrb[32].mxu1 %v1820_v9 }
 0x9bd   :  { %1974 = vmatprep.mubr.bf16.mxu1 %v3196_v35  ;;  %2654 = vmatpush3.bf16.msra.mxu0 %v3041_v51  ;;  %v3044_v35 = vld [vmem:[#allocation9] sm:$0xff]  }
 0x9be   :  { %2655 = vmatprep.subr.bf16.mxu0 %v3042_v4  ;;  %2871 = vmatprep.subr.bf16.mxu1 %v3044_v35 }
 0x9bf   :  { %2872 = vmatpush3.bf16.msra.mxu1 %v3044_v35 }
 0x9c0   :  { %2873 = vmatprep.subr.bf16.mxu1 %v3045_v55 }
 0x9c1   :  { %2656 = vmatpush3.bf16.msra.mxu0 %v3043_v19 }
 0x9c3   :  { %2874 = vmatpush3.bf16.msra.mxu1 %v3045_v55 }
 0x9c4   :  { %1975 = vmatmul.mubr.bf16.gmra.mrb[36].mxu1 %v1821_v7  ;;  %2875 = vmatprep.subr.bf16.mxu1 %v3046_v24 }
 0x9c7   :  { %2876 = vmatpush3.bf16.msra.mxu1 %v3046_v24 }
 0x9c8   :  { %2877 = vmatprep.subr.bf16.mxu1 %v3047_v37 }
 0x9cb   :  { %2878 = vmatpush3.bf16.msra.mxu1 %v3047_v37 }
 0x9cc   :  { %2879 = vmatprep.subr.bf16.mxu1 %v3048_v38 }
 0x9cf   :  { %2880 = vmatpush3.bf16.msra.mxu1 %v3048_v38 }
 0x9d0   :  { %2881 = vmatprep.subr.bf16.mxu1 %v3049_v39 }
 0x9d3   :  { %2882 = vmatpush3.bf16.msra.mxu1 %v3049_v39 }
 0x9d4   :  { %2883 = vmatprep.subr.bf16.mxu1 %v3050_v40 }
 0x9d7   :  { %2884 = vmatpush3.bf16.msra.mxu1 %v3050_v40 }
 0x9d8   :  { %2885 = vmatprep.subr.bf16.mxu1 %v3051_v41 }
 0x9db   :  { %2886 = vmatpush3.bf16.msra.mxu1 %v3051_v41 }
 0xa8f   :  { %v1966_v14 = vpop.f32.mrb[32].mxu1 }
 0xa90   :  { %v1967_v15 = vadd.f32 %v1966_v14, %v1845_v6  ;;  %v1968_v18 = vpop.f32.mrb[33].mxu1 }
 0xa91   :  { %v1969_v16 = vadd.f32 %v1968_v18, %v1849_v13  ;;  %v1970_v17 = vpop.f32.mrb[34].mxu1 }
 0xa92   :  { %v1971_v20 = vadd.f32 %v1970_v17, %v1845_v6  ;;  %v1972_v21 = vpop.f32.mrb[35].mxu1  ;;  %v1985_v23 = vmax.f32 %v1967_v15, 0.0 }
 0xa93   :  { %v1973_v22 = vadd.f32 %v1972_v21, %v1849_v13  ;;  %v1986_v25 = vmax.f32 %v1969_v16, 0.0 }
 0xa94   :  { %v1987_v56 = vmax.f32 %v1971_v20, 0.0 }
 0xa95   :  { %v1988_v26 = vmax.f32 %v1973_v22, 0.0 }
 0xa96   :  { %v1993_v27 = vpack.c.bf16 %v1987_v56, %v1985_v23 }
 0xa97   :  { %v1994_v61 = vpack.c.bf16 %v1988_v26, %v1986_v25  ;;  %v1976_v2 = vpop.f32.mrb[36].mxu1 }
 0xa98   :  { %v1977_v60 = vadd.f32 %v1976_v2, %v1845_v6  ;;  %v1978_v11 = vpop.f32.mrb[37].mxu1 }
 0xa99   :  { %v1979_v28 = vadd.f32 %v1978_v11, %v1849_v13  ;;  %v1980_v1 = vpop.f32.mrb[38].mxu1  ;;  %2166 = vmatprep.mubr.bf16.mxu0 %v1994_v61 }
 0xa9a   :  { %v1981_v12 = vadd.f32 %v1980_v1, %v1845_v6  ;;  %v1982_v29 = vpop.f32.mrb[39].mxu1  ;;  %2167 = vmatmul.mubr.bf16.vlgmr.msra.gmra.mrb[32].mxu0 %v1993_v27  ;;  %v1989_v31 = vmax.f32 %v1977_v60, 0.0 }
 0xa9b   :  { %v1983_v30 = vadd.f32 %v1982_v29, %v1849_v13  ;;  %v1990_v33 = vmax.f32 %v1979_v28, 0.0 }
 0xa9c   :  { %v1991_v32 = vmax.f32 %v1981_v12, 0.0 }
 0xa9d   :  { %v1992_v34 = vmax.f32 %v1983_v30, 0.0 }
 0xa9e   :  { %v1995_v8 = vpack.c.bf16 %v1991_v32, %v1989_v31 }
 0xa9f   :  { %v1996_v36 = vpack.c.bf16 %v1992_v34, %v1990_v33 }
 0xaa1   :  { %2174 = vmatprep.mubr.bf16.mxu0 %v1996_v36 }
 0xaa2   :  { %2175 = vmatmul.mubr.bf16.gmra.mrb[36].mxu0 %v1995_v8 }
 0xb6d   :  { %v2657_v42 = vpop.f32.mrb[32].mxu0 }
 0xb6e   :  { %v2658_v44 = vpop.f32.mrb[33].mxu0 }
 0xb6f   :  { %v2659_v45 = vadd.f32 %v2658_v44, %v2657_v42  ;;  %v2660_v46 = vpop.f32.mrb[34].mxu0 }
 0xb70   :  { %v2661_v47 = vpop.f32.mrb[35].mxu0 }
 0xb71   :  { %v2169_v48 = vadd.f32 %v2659_v45, %v2491_v43  ;;  %v2662_v49 = vadd.f32 %v2661_v47, %v2660_v46 }
 0xb73   :  { %v2172_v50 = vadd.f32 %v2662_v49, %v2491_v43  ;;  %v2183_v52 = vadd.f32 %v2169_v48, %v3703_v57  ;;  %v2508_v57 = vld [vmem:[%s3762_s14] ss:$0 sm:$0xff] }
 0xb75   :  { %v2184_v53 = vadd.f32 %v2172_v50, %v3706_v58  ;;  %v2663_v54 = vpop.f32.mrb[36].mxu0 }
 0xb76   :  { %v2664_v59 = vpop.f32.mrb[37].mxu0 }
 0xb77   :  { %v2665_v9 = vadd.f32 %v2664_v59, %v2663_v54  ;;  %v2666_v10 = vpop.f32.mrb[38].mxu0  ;;  %v2187_v7 = vpack.c.bf16 %v2184_v53, %v2183_v52 }
 0xb78   :  { %v2667_v63 = vpop.f32.mrb[39].mxu0 }
 0xb79   :  { %v2177_v3 = vadd.f32 %v2665_v9, %v2491_v43  ;;  %v2668_v51 = vadd.f32 %v2667_v63, %v2666_v10  ;;  %2887 = vmatprep.mubr.bf16.mxu1 %v2187_v7 }
 0xb7b   :  { %v2180_v4 = vadd.f32 %v2668_v51, %v2491_v43  ;;  %v2185_v19 = vadd.f32 %v2177_v3, %v3715_v0 }
 0xb7d   :  { %v2186_v35 = vadd.f32 %v2180_v4, %v3712_v62 }
 0xb7f   :  { %v2188_v55 = vpack.c.bf16 %v2186_v35, %v2185_v19 }
 0xb81   :  { %2888 = vmatmul.mubr.bf16.vlgmr.msra.gmra.mrb[40].mxu1 %v2188_v55 }
 0xc54   :  { %v2889_v58 = vpop.f32.mrb[40].mxu1 }
 0xc55   :  { %v2303_v24 = vadd.f32 %v2889_v58, %v2508_v57  ;;  %v2294_v5 = vpop.f32.mrb[41].mxu1 }
 0xc56   :  { %v2295_v6 = vadd.f32 %v2508_v57, %v2294_v5  ;;  %v2890_v13 = vpop.f32.mrb[42].mxu1 }
 0xc57   :  { %2311 = vst [vmem:[%s3763_s15 + $0x10] sm:$0xff] %v2303_v24  ;;  %v2306_v14 = vadd.f32 %v2890_v13, %v2508_v57  ;;  %v2297_v15 = vpop.f32.mrb[43].mxu1 }
 0xc58   :  { %2309 = vst [vmem:[%s3763_s15] sm:$0xff] %v2295_v6  ;;  %v2298_v62 = vadd.f32 %v2508_v57, %v2297_v15 }
 0xc59   :  { %2312 = vst [vmem:[%s3763_s15 + $0x18] sm:$0xff] %v2306_v14 }
 0xc5a   :  { %2310 = vst [vmem:[%s3763_s15 + $0x8] sm:$0xff] %v2298_v62 }
 0xc5b   :  { %2321 = vsyncpa [#allocation3], 1 }
 0xc5c   :  { %2322 = vsyncpa [#allocation5], 1 }
 0xc5d   :  { %2323 = vsyncpa [#allocation8], 1 }

</bundles_post_ra>
